<compile_context>
chip_gen: v7x
topology: tpu7x:2x2x1
jax: 0.10.0
libtpu: 0.0.40
codegen_flags: <defaults>
</compile_context>

<pallas_src>
import functools
import math

import jax
import jax.numpy as jnp
from jax import lax
from jax.experimental import pallas as pl
from jax.experimental.pallas import tpu as pltpu


# ------------------------------ fused kernel -------------------------------

def _temporal_gt_kernel(lens_ref,                      # SMEM scalar-prefetch (B,)
                        x_ref,                         # (B*S, E) input activation
                        wqkv_ref, bqkv_ref,            # (E, 3E), (1, 3E)
                        wout_ref, bout_ref,            # (H, D, E), (1, E)
                        w1_ref, b1_ref,                # (E, F), (1, F)
                        w2_ref, b2_ref,                # (F, E), (1, E)
                        g1_ref, be1_ref,               # (1, E) LayerNorm1
                        g2_ref, be2_ref,               # (1, E) LayerNorm2
                        out_ref,                       # (B, E) pooled output
                        x_scr, qkv_scr, attn_scr,      # VMEM scratch
                        *, seq, batch, nhead, eps):
    l = pl.program_id(0)
    e = x_scr.shape[-1]
    d = e // nhead
    scale = jnp.float32(1.0 / math.sqrt(d))

    # Load the HBM input only once; afterwards the activation is carried in
    # VMEM across grid steps (x_scr).
    @pl.when(l == 0)
    def _():
        x_scr[...] = x_ref[...]

    x2 = x_scr[...]                                             # (B*S, E)

    # ---- fused QKV projection: one MXU GEMM for all tokens / heads ----
    qkv_scr[...] = (jnp.dot(x2, wqkv_ref[...],
                            preferred_element_type=jnp.float32) + bqkv_ref[...])

    # ---- multi-head self-attention + out-projection, per batch element ----
    col = lax.broadcasted_iota(jnp.int32, (1, seq), 1)
    for b in range(batch):                       # static toy-size loop (unrolled)
        len_b = lens_ref[b]
        # additive key-padding bias built in-kernel (no HBM mask array)
        bias = jnp.where(col >= len_b, jnp.float32(-1e30), jnp.float32(0.0))
        r0 = b * seq
        acc = jnp.zeros((seq, e), jnp.float32)
        for h in range(nhead):
            q = qkv_scr[r0:r0 + seq, h * d:(h + 1) * d]                  # (S, D)
            k = qkv_scr[r0:r0 + seq, e + h * d:e + (h + 1) * d]          # (S, D)
            v = qkv_scr[r0:r0 + seq, 2 * e + h * d:2 * e + (h + 1) * d]  # (S, D)
            s = jnp.dot(q, k.T, preferred_element_type=jnp.float32) * scale
            s = s + bias                                                 # (S, S)
            mx = jnp.max(s, axis=-1, keepdims=True)
            p = jnp.exp(s - mx)
            p = p * pl.reciprocal(jnp.sum(p, axis=-1, keepdims=True), approx=True)
            o = jnp.dot(p, v, preferred_element_type=jnp.float32)        # (S, D)
            # fold the head-concat into the out-projection: sum_h o_h @ Wout_h
            acc = acc + jnp.dot(o, wout_ref[h],
                                preferred_element_type=jnp.float32)      # (S, E)
        attn_scr[r0:r0 + seq, :] = acc + bout_ref[...]

    def layer_norm(y, g, bta):
        mu = jnp.mean(y, axis=-1, keepdims=True)
        var = jnp.mean(jnp.square(y - mu), axis=-1, keepdims=True)
        return (y - mu) * lax.rsqrt(var + eps) * g + bta

    # ---- residual + LayerNorm1 (post-norm, PyTorch default) ----
    src = layer_norm(x2 + attn_scr[...], g1_ref[...], be1_ref[...])

    # ---- feed-forward (ReLU) + residual + LayerNorm2 ----
    h1 = jnp.dot(src, w1_ref[...], preferred_element_type=jnp.float32) + b1_ref[...]
    h1 = jnp.maximum(h1, jnp.float32(0.0))
    h2 = jnp.dot(h1, w2_ref[...], preferred_element_type=jnp.float32) + b2_ref[...]
    out_l = layer_norm(src + h2, g2_ref[...], be2_ref[...])

    x_scr[...] = out_l                                        # carry to next layer

    # ---- fused masked mean-pool on the final layer ----
    @pl.when(l == pl.num_programs(0) - 1)
    def _():
        row = lax.broadcasted_iota(jnp.int32, (seq, 1), 0)
        for b in range(batch):
            len_b = lens_ref[b]
            keep = (row < len_b).astype(jnp.float32)                     # (S, 1)
            rows = x_scr[b * seq:(b + 1) * seq, :]                       # (S, E)
            pooled = jnp.sum(rows * keep, axis=0, keepdims=True)         # (1, E)
            # reference divides by (length + 1); mirror it exactly
            out_ref[b:b + 1, :] = pooled / (len_b + 1).astype(jnp.float32)


# ------------------------------ wrapper / glue ------------------------------

def temporal_gt_forward(x, lengths, params, nhead):
    """x: (S, B, E) f32, lengths: (B, 1) int32 -> (B, E) f32."""
    s, b, e = x.shape
    n = b * s
    nlayers = params["wqkv"].shape[0]
    dff = params["w1"].shape[-1]
    d = e // nhead

    # one-time relayout of the input to a lane-dense (B*S, E) slab
    x2 = jnp.transpose(x, (1, 0, 2)).reshape(n, e)
    lens = lengths.reshape(b).astype(jnp.int32)

    def layer_map(ndims):
        return lambda l, lens_ref: (l,) + (0,) * ndims

    grid_spec = pltpu.PrefetchScalarGridSpec(
        num_scalar_prefetch=1,
        grid=(nlayers,),
        in_specs=[
            pl.BlockSpec((n, e), lambda l, lens_ref: (0, 0)),       # activation
            pl.BlockSpec((None, e, 3 * e), layer_map(2)),           # wqkv
            pl.BlockSpec((None, 1, 3 * e), layer_map(2)),           # bqkv
            pl.BlockSpec((None, nhead, d, e), layer_map(3)),        # wout (per head)
            pl.BlockSpec((None, 1, e), layer_map(2)),               # bout
            pl.BlockSpec((None, e, dff), layer_map(2)),             # w1
            pl.BlockSpec((None, 1, dff), layer_map(2)),             # b1
            pl.BlockSpec((None, dff, e), layer_map(2)),             # w2
            pl.BlockSpec((None, 1, e), layer_map(2)),               # b2
            pl.BlockSpec((None, 1, e), layer_map(2)),               # ln1 gamma
            pl.BlockSpec((None, 1, e), layer_map(2)),               # ln1 beta
            pl.BlockSpec((None, 1, e), layer_map(2)),               # ln2 gamma
            pl.BlockSpec((None, 1, e), layer_map(2)),               # ln2 beta
        ],
        out_specs=pl.BlockSpec((b, e), lambda l, lens_ref: (0, 0)),
        scratch_shapes=[
            pltpu.VMEM((n, e), jnp.float32),       # activation, carried across layers
            pltpu.VMEM((n, 3 * e), jnp.float32),   # fused QKV
            pltpu.VMEM((n, e), jnp.float32),       # attention + out-proj result
        ],
    )

    kernel = functools.partial(_temporal_gt_kernel, seq=s, batch=b,
                               nhead=nhead, eps=1e-5)
    return pl.pallas_call(
        kernel,
        grid_spec=grid_spec,
        out_shape=jax.ShapeDtypeStruct((b, e), jnp.float32),
        compiler_params=pltpu.CompilerParams(
            dimension_semantics=("arbitrary",)),   # layers are sequential
    )(lens, x2,
      params["wqkv"], params["bqkv"], params["wout"], params["bout"],
      params["w1"], params["b1"], params["w2"], params["b2"],
      params["g1"], params["be1"], params["g2"], params["be2"])


# -------------------------- pure-JAX reference ------------------------------

def temporal_gt_reference(x, lengths, params, nhead, eps=1e-5):
    s, b, e = x.shape
    nl = params["wqkv"].shape[0]
    h = nhead
    d = e // h
    lens = lengths.reshape(b).astype(jnp.int32)
    xb = jnp.transpose(x, (1, 0, 2))                       # (B, S, E)
    col = jnp.arange(s)[None, :]
    bias = jnp.where(col >= lens[:, None], -1e30, 0.0)     # (B, S)

    def layer_norm(y, g, bta):
        mu = jnp.mean(y, axis=-1, keepdims=True)
        var = jnp.mean(jnp.square(y - mu), axis=-1, keepdims=True)
        return (y - mu) * lax.rsqrt(var + eps) * g + bta

    out = xb
    for l in range(nl):
        qkv = out @ params["wqkv"][l] + params["bqkv"][l]          # (B, S, 3E)
        q = qkv[..., :e].reshape(b, s, h, d).transpose(0, 2, 1, 3)
        k = qkv[..., e:2 * e].reshape(b, s, h, d).transpose(0, 2, 1, 3)
        v = qkv[..., 2 * e:].reshape(b, s, h, d).transpose(0, 2, 1, 3)
        sc = jnp.einsum('bhqd,bhkd->bhqk', q, k) / math.sqrt(d)
        sc = sc + bias[:, None, None, :]
        p = jax.nn.softmax(sc, axis=-1)
        o = jnp.einsum('bhqk,bhkd->bhqd', p, v)
        attn = jnp.einsum('bhqd,hde->bqe', o, params["wout"][l]) + params["bout"][l]
        src = layer_norm(out + attn, params["g1"][l], params["be1"][l])
        ff = jnp.maximum(src @ params["w1"][l] + params["b1"][l], 0.0)
        ff = ff @ params["w2"][l] + params["b2"][l]
        out = layer_norm(src + ff, params["g2"][l], params["be2"][l])

    keep = (col < lens[:, None]).astype(jnp.float32)               # (B, S)
    pooled = jnp.einsum('bse,bs->be', out, keep)
    return pooled / (lens[:, None] + 1).astype(jnp.float32)


# ------------------------------ parameter init ------------------------------

def init_params(key, hidden_dim, nhead, nlayers, dff):
    e, h, f, nl = hidden_dim, nhead, dff, nlayers
    d = e // h
    keys = jax.random.split(key, 4 * nl)

    def w(k, shape):
        return 0.05 * jax.random.normal(k, shape, dtype=jnp.float32)

    wqkv = jnp.stack([w(keys[4 * i + 0], (e, 3 * e)) for i in range(nl)])
    # out-projection stored per head: (L, H, D, E) == Wout^T rows grouped by head
    wout = jnp.stack([w(keys[4 * i + 1], (e, e)).reshape(h, d, e) for i in range(nl)])
    w1 = jnp.stack([w(keys[4 * i + 2], (e, f)) for i in range(nl)])
    w2 = jnp.stack([w(keys[4 * i + 3], (f, e)) for i in range(nl)])
    return {
        "wqkv": wqkv,
        "bqkv": jnp.zeros((nl, 1, 3 * e), jnp.float32),
        "wout": wout,
        "bout": jnp.zeros((nl, 1, e), jnp.float32),
        "w1": w1,
        "b1": jnp.zeros((nl, 1, f), jnp.float32),
        "w2": w2,
        "b2": jnp.zeros((nl, 1, e), jnp.float32),
        "g1": jnp.ones((nl, 1, e), jnp.float32),
        "be1": jnp.zeros((nl, 1, e), jnp.float32),
        "g2": jnp.ones((nl, 1, e), jnp.float32),
        "be2": jnp.zeros((nl, 1, e), jnp.float32),
    }


# ----------------------------------- main -----------------------------------

if __name__ == "__main__":
    S, B, HIDDEN, NHEAD, NLAYERS = 8, 2, 32, 4, 2   # dim_feedforward == hidden_dim

    key = jax.random.PRNGKey(0)
    kx, kp = jax.random.split(key)
    x = jax.random.normal(kx, (S, B, HIDDEN), dtype=jnp.float32)   # (seq, batch, hidden)
    lengths = jnp.array([[5], [8]], dtype=jnp.int32)               # (batch, 1)
    params = init_params(kp, HIDDEN, NHEAD, NLAYERS, dff=HIDDEN)

    # TODO(synk): dropout is a no-op here (inference/eval semantics); training-
    # mode dropout masks are not implemented.
    fwd = jax.jit(functools.partial(temporal_gt_forward, nhead=NHEAD))
    out = jax.block_until_ready(fwd(x, lengths, params))

    assert out.shape == (B, HIDDEN) and out.dtype == jnp.float32
    assert bool(jnp.all(jnp.isfinite(out)))

    # correctness vs. plain-JAX reference (loose tol: softmax uses EUP approx recip)
    ref = temporal_gt_reference(x, lengths, params, NHEAD)
    max_err = float(jnp.max(jnp.abs(out - ref)))
    assert max_err < 1e-2, f"max abs err {max_err}"

    print("KERNEL_OK")
</pallas_src>

<mosaic_0001>
module attributes {stable_mosaic.version = 11 : i64} {
  func.func @_temporal_gt_kernel(%arg0: i32, %arg1: memref<2xi32, #tpu.memory_space<smem>>, %arg2: memref<16x32xf32, #tpu.memory_space<vmem>>, %arg3: memref<1x32x96xf32, #tpu.memory_space<vmem>>, %arg4: memref<1x1x96xf32, #tpu.memory_space<vmem>>, %arg5: memref<1x4x8x32xf32, #tpu.memory_space<vmem>>, %arg6: memref<1x1x32xf32, #tpu.memory_space<vmem>>, %arg7: memref<1x32x32xf32, #tpu.memory_space<vmem>>, %arg8: memref<1x1x32xf32, #tpu.memory_space<vmem>>, %arg9: memref<1x32x32xf32, #tpu.memory_space<vmem>>, %arg10: memref<1x1x32xf32, #tpu.memory_space<vmem>>, %arg11: memref<1x1x32xf32, #tpu.memory_space<vmem>>, %arg12: memref<1x1x32xf32, #tpu.memory_space<vmem>>, %arg13: memref<1x1x32xf32, #tpu.memory_space<vmem>>, %arg14: memref<1x1x32xf32, #tpu.memory_space<vmem>>, %arg15: memref<2x32xf32, #tpu.memory_space<vmem>>, %arg16: memref<16x32xf32, #tpu.memory_space<vmem>>, %arg17: memref<16x96xf32, #tpu.memory_space<vmem>>, %arg18: memref<16x32xf32, #tpu.memory_space<vmem>>) attributes {dimension_semantics = [#tpu.dimension_semantics<arbitrary>], iteration_bounds = array<i64: 2>, scalar_prefetch = 1 : i64, scratch_operands = 3 : i64, tpu.core_type = #tpu.core_type<tc>, window_params = [{pipeline_mode = #tpu.pipeline_mode<synchronous>, transform_indices = @transform_0, window_bounds = array<i64: 16, 32>}, {transform_indices = @transform_1, window_bounds = array<i64: 1, 32, 96>}, {transform_indices = @transform_2, window_bounds = array<i64: 1, 1, 96>}, {transform_indices = @transform_3, window_bounds = array<i64: 1, 4, 8, 32>}, {transform_indices = @transform_4, window_bounds = array<i64: 1, 1, 32>}, {transform_indices = @transform_5, window_bounds = array<i64: 1, 32, 32>}, {transform_indices = @transform_6, window_bounds = array<i64: 1, 1, 32>}, {transform_indices = @transform_7, window_bounds = array<i64: 1, 32, 32>}, {transform_indices = @transform_8, window_bounds = array<i64: 1, 1, 32>}, {transform_indices = @transform_9, window_bounds = array<i64: 1, 1, 32>}, {transform_indices = @transform_10, window_bounds = array<i64: 1, 1, 32>}, {transform_indices = @transform_11, window_bounds = array<i64: 1, 1, 32>}, {transform_indices = @transform_12, window_bounds = array<i64: 1, 1, 32>}, {pipeline_mode = #tpu.pipeline_mode<synchronous>, transform_indices = @transform_13, window_bounds = array<i64: 2, 32>}]} {
    %c0_i32 = arith.constant 0 : i32
    %0 = arith.cmpi eq, %arg0, %c0_i32 : i32
    %1 = arith.extui %0 : i1 to i32
    %c0_i32_0 = arith.constant 0 : i32
    %2 = arith.cmpi ne, %1, %c0_i32_0 : i32
    scf.if %2 {
      %c0_184 = arith.constant 0 : index
      %c0_185 = arith.constant 0 : index
      %304 = vector.load %arg2[%c0_184, %c0_185] : memref<16x32xf32, #tpu.memory_space<vmem>>, vector<16x32xf32>
      %c0_186 = arith.constant 0 : index
      %c0_187 = arith.constant 0 : index
      %305 = vector.load %arg16[%c0_186, %c0_187] : memref<16x32xf32, #tpu.memory_space<vmem>>, vector<16x32xf32>
      tpu.vector_store %arg16[%c0_186, %c0_187], %304 {strides = array<i32>} : memref<16x32xf32, #tpu.memory_space<vmem>>, vector<16x32xf32>,
    } else {
    }
    %c0 = arith.constant 0 : index
    %c0_1 = arith.constant 0 : index
    %3 = vector.load %arg16[%c0, %c0_1] : memref<16x32xf32, #tpu.memory_space<vmem>>, vector<16x32xf32>
    %c0_2 = arith.constant 0 : index
    %c0_3 = arith.constant 0 : index
    %c0_4 = arith.constant 0 : index
    %4 = vector.load %arg3[%c0_2, %c0_3, %c0_4] : memref<1x32x96xf32, #tpu.memory_space<vmem>>, vector<1x32x96xf32>
    %5 = vector.shape_cast %4 : vector<1x32x96xf32> to vector<32x96xf32>
    %cst = arith.constant dense<0.000000e+00> : vector<16x96xf32>
    %6 = tpu.matmul %3, %5, %cst {dimension_numbers = #tpu.dot_dimension_numbers<[1], [0], [0], [1], [0, 0, 1, 1], [], []>} : vector<16x32xf32>, vector<32x96xf32>, vector<16x96xf32> -> vector<16x96xf32>
    %c0_5 = arith.constant 0 : index
    %c0_6 = arith.constant 0 : index
    %c0_7 = arith.constant 0 : index
    %7 = vector.load %arg4[%c0_5, %c0_6, %c0_7] : memref<1x1x96xf32, #tpu.memory_space<vmem>>, vector<1x1x96xf32>
    %8 = vector.shape_cast %7 : vector<1x1x96xf32> to vector<1x96xf32>
    %9 = vector.broadcast %8 : vector<1x96xf32> to vector<16x96xf32>
    %10 = arith.addf %6, %9 : vector<16x96xf32>
    %c0_8 = arith.constant 0 : index
    %c0_9 = arith.constant 0 : index
    %11 = vector.load %arg17[%c0_8, %c0_9] : memref<16x96xf32, #tpu.memory_space<vmem>>, vector<16x96xf32>
    tpu.vector_store %arg17[%c0_8, %c0_9], %10 {strides = array<i32>} : memref<16x96xf32, #tpu.memory_space<vmem>>, vector<16x96xf32>,
    %12 = tpu.iota {dimensions = array<i32: 1>} : vector<1x8xi32>
    %c0_10 = arith.constant 0 : index
    %13 = memref.load %arg1[%c0_10] : memref<2xi32, #tpu.memory_space<smem>>
    %14 = vector.broadcast %13 : i32 to vector<1x8xi32>
    %15 = arith.cmpi sge, %12, %14 : vector<1x8xi32>
    %cst_11 = arith.constant -1.000000e+30 : f32
    %cst_12 = arith.constant 0.000000e+00 : f32
    %16 = vector.broadcast %cst_11 : f32 to vector<1x8xf32>
    %17 = vector.broadcast %cst_12 : f32 to vector<1x8xf32>
    %18 = arith.select %15, %16, %17 : vector<1x8xi1>, vector<1x8xf32>
    %cst_13 = arith.constant 0.000000e+00 : f32
    %19 = vector.broadcast %cst_13 : f32 to vector<8x32xf32>
    %c0_14 = arith.constant 0 : index
    %c0_15 = arith.constant 0 : index
    %20 = vector.load %arg17[%c0_14, %c0_15] : memref<16x96xf32, #tpu.memory_space<vmem>>, vector<8x8xf32>
    %c0_16 = arith.constant 0 : index
    %c32 = arith.constant 32 : index
    %21 = vector.load %arg17[%c0_16, %c32] : memref<16x96xf32, #tpu.memory_space<vmem>>, vector<8x8xf32>
    %c0_17 = arith.constant 0 : index
    %c64 = arith.constant 64 : index
    %22 = vector.load %arg17[%c0_17, %c64] : memref<16x96xf32, #tpu.memory_space<vmem>>, vector<8x8xf32>
    %23 = tpu.transpose %21, [1, 0] : vector<8x8xf32> -> vector<8x8xf32>
    %cst_18 = arith.constant dense<0.000000e+00> : vector<8x8xf32>
    %24 = tpu.matmul %20, %23, %cst_18 {dimension_numbers = #tpu.dot_dimension_numbers<[1], [0], [0], [1], [0, 0, 1, 1], [], []>} : vector<8x8xf32>, vector<8x8xf32>, vector<8x8xf32> -> vector<8x8xf32>
    %cst_19 = arith.constant 0.353553385 : f32
    %25 = vector.broadcast %cst_19 : f32 to vector<8x8xf32>
    %26 = arith.mulf %24, %25 : vector<8x8xf32>
    %27 = vector.broadcast %18 : vector<1x8xf32> to vector<8x8xf32>
    %28 = arith.addf %26, %27 : vector<8x8xf32>
    %cst_20 = arith.constant dense<0xFF800000> : vector<8xf32>
    %29 = vector.multi_reduction <maximumf>, %28, %cst_20 [1] : vector<8x8xf32> to vector<8xf32>
    %30 = vector.shape_cast %29 : vector<8xf32> to vector<8x1xf32>
    %31 = vector.broadcast %30 : vector<8x1xf32> to vector<8x8xf32>
    %32 = arith.subf %28, %31 : vector<8x8xf32>
    %33 = math.exp %32 : vector<8x8xf32>
    %cst_21 = arith.constant dense<0.000000e+00> : vector<8xf32>
    %34 = vector.multi_reduction <add>, %33, %cst_21 [1] : vector<8x8xf32> to vector<8xf32>
    %35 = vector.shape_cast %34 : vector<8xf32> to vector<8x1xf32>
    %36 = tpu.reciprocal %35 {approx = true} : vector<8x1xf32> -> vector<8x1xf32>
    %37 = vector.broadcast %36 : vector<8x1xf32> to vector<8x8xf32>
    %38 = arith.mulf %33, %37 : vector<8x8xf32>
    %cst_22 = arith.constant dense<0.000000e+00> : vector<8x8xf32>
    %39 = tpu.matmul %38, %22, %cst_22 {dimension_numbers = #tpu.dot_dimension_numbers<[1], [0], [0], [1], [0, 0, 1, 1], [], []>} : vector<8x8xf32>, vector<8x8xf32>, vector<8x8xf32> -> vector<8x8xf32>
    %c0_23 = arith.constant 0 : index
    %c0_24 = arith.constant 0 : index
    %c0_25 = arith.constant 0 : index
    %c0_26 = arith.constant 0 : index
    %40 = vector.load %arg5[%c0_23, %c0_24, %c0_25, %c0_26] : memref<1x4x8x32xf32, #tpu.memory_space<vmem>>, vector<1x1x8x32xf32>
    %41 = vector.shape_cast %40 : vector<1x1x8x32xf32> to vector<8x32xf32>
    %cst_27 = arith.constant dense<0.000000e+00> : vector<8x32xf32>
    %42 = tpu.matmul %39, %41, %cst_27 {dimension_numbers = #tpu.dot_dimension_numbers<[1], [0], [0], [1], [0, 0, 1, 1], [], []>} : vector<8x8xf32>, vector<8x32xf32>, vector<8x32xf32> -> vector<8x32xf32>
    %43 = arith.addf %19, %42 : vector<8x32xf32>
    %c0_28 = arith.constant 0 : index
    %c8 = arith.constant 8 : index
    %44 = vector.load %arg17[%c0_28, %c8] : memref<16x96xf32, #tpu.memory_space<vmem>>, vector<8x8xf32>
    %c0_29 = arith.constant 0 : index
    %c40 = arith.constant 40 : index
    %45 = vector.load %arg17[%c0_29, %c40] : memref<16x96xf32, #tpu.memory_space<vmem>>, vector<8x8xf32>
    %c0_30 = arith.constant 0 : index
    %c72 = arith.constant 72 : index
    %46 = vector.load %arg17[%c0_30, %c72] : memref<16x96xf32, #tpu.memory_space<vmem>>, vector<8x8xf32>
    %47 = tpu.transpose %45, [1, 0] : vector<8x8xf32> -> vector<8x8xf32>
    %cst_31 = arith.constant dense<0.000000e+00> : vector<8x8xf32>
    %48 = tpu.matmul %44, %47, %cst_31 {dimension_numbers = #tpu.dot_dimension_numbers<[1], [0], [0], [1], [0, 0, 1, 1], [], []>} : vector<8x8xf32>, vector<8x8xf32>, vector<8x8xf32> -> vector<8x8xf32>
    %cst_32 = arith.constant 0.353553385 : f32
    %49 = vector.broadcast %cst_32 : f32 to vector<8x8xf32>
    %50 = arith.mulf %48, %49 : vector<8x8xf32>
    %51 = vector.broadcast %18 : vector<1x8xf32> to vector<8x8xf32>
    %52 = arith.addf %50, %51 : vector<8x8xf32>
    %cst_33 = arith.constant dense<0xFF800000> : vector<8xf32>
    %53 = vector.multi_reduction <maximumf>, %52, %cst_33 [1] : vector<8x8xf32> to vector<8xf32>
    %54 = vector.shape_cast %53 : vector<8xf32> to vector<8x1xf32>
    %55 = vector.broadcast %54 : vector<8x1xf32> to vector<8x8xf32>
    %56 = arith.subf %52, %55 : vector<8x8xf32>
    %57 = math.exp %56 : vector<8x8xf32>
    %cst_34 = arith.constant dense<0.000000e+00> : vector<8xf32>
    %58 = vector.multi_reduction <add>, %57, %cst_34 [1] : vector<8x8xf32> to vector<8xf32>
    %59 = vector.shape_cast %58 : vector<8xf32> to vector<8x1xf32>
    %60 = tpu.reciprocal %59 {approx = true} : vector<8x1xf32> -> vector<8x1xf32>
    %61 = vector.broadcast %60 : vector<8x1xf32> to vector<8x8xf32>
    %62 = arith.mulf %57, %61 : vector<8x8xf32>
    %cst_35 = arith.constant dense<0.000000e+00> : vector<8x8xf32>
    %63 = tpu.matmul %62, %46, %cst_35 {dimension_numbers = #tpu.dot_dimension_numbers<[1], [0], [0], [1], [0, 0, 1, 1], [], []>} : vector<8x8xf32>, vector<8x8xf32>, vector<8x8xf32> -> vector<8x8xf32>
    %c0_36 = arith.constant 0 : index
    %c1 = arith.constant 1 : index
    %c0_37 = arith.constant 0 : index
    %c0_38 = arith.constant 0 : index
    %64 = vector.load %arg5[%c0_36, %c1, %c0_37, %c0_38] : memref<1x4x8x32xf32, #tpu.memory_space<vmem>>, vector<1x1x8x32xf32>
    %65 = vector.shape_cast %64 : vector<1x1x8x32xf32> to vector<8x32xf32>
    %cst_39 = arith.constant dense<0.000000e+00> : vector<8x32xf32>
    %66 = tpu.matmul %63, %65, %cst_39 {dimension_numbers = #tpu.dot_dimension_numbers<[1], [0], [0], [1], [0, 0, 1, 1], [], []>} : vector<8x8xf32>, vector<8x32xf32>, vector<8x32xf32> -> vector<8x32xf32>
    %67 = arith.addf %43, %66 : vector<8x32xf32>
    %c0_40 = arith.constant 0 : index
    %c16 = arith.constant 16 : index
    %68 = vector.load %arg17[%c0_40, %c16] : memref<16x96xf32, #tpu.memory_space<vmem>>, vector<8x8xf32>
    %c0_41 = arith.constant 0 : index
    %c48 = arith.constant 48 : index
    %69 = vector.load %arg17[%c0_41, %c48] : memref<16x96xf32, #tpu.memory_space<vmem>>, vector<8x8xf32>
    %c0_42 = arith.constant 0 : index
    %c80 = arith.constant 80 : index
    %70 = vector.load %arg17[%c0_42, %c80] : memref<16x96xf32, #tpu.memory_space<vmem>>, vector<8x8xf32>
    %71 = tpu.transpose %69, [1, 0] : vector<8x8xf32> -> vector<8x8xf32>
    %cst_43 = arith.constant dense<0.000000e+00> : vector<8x8xf32>
    %72 = tpu.matmul %68, %71, %cst_43 {dimension_numbers = #tpu.dot_dimension_numbers<[1], [0], [0], [1], [0, 0, 1, 1], [], []>} : vector<8x8xf32>, vector<8x8xf32>, vector<8x8xf32> -> vector<8x8xf32>
    %cst_44 = arith.constant 0.353553385 : f32
    %73 = vector.broadcast %cst_44 : f32 to vector<8x8xf32>
    %74 = arith.mulf %72, %73 : vector<8x8xf32>
    %75 = vector.broadcast %18 : vector<1x8xf32> to vector<8x8xf32>
    %76 = arith.addf %74, %75 : vector<8x8xf32>
    %cst_45 = arith.constant dense<0xFF800000> : vector<8xf32>
    %77 = vector.multi_reduction <maximumf>, %76, %cst_45 [1] : vector<8x8xf32> to vector<8xf32>
    %78 = vector.shape_cast %77 : vector<8xf32> to vector<8x1xf32>
    %79 = vector.broadcast %78 : vector<8x1xf32> to vector<8x8xf32>
    %80 = arith.subf %76, %79 : vector<8x8xf32>
    %81 = math.exp %80 : vector<8x8xf32>
    %cst_46 = arith.constant dense<0.000000e+00> : vector<8xf32>
    %82 = vector.multi_reduction <add>, %81, %cst_46 [1] : vector<8x8xf32> to vector<8xf32>
    %83 = vector.shape_cast %82 : vector<8xf32> to vector<8x1xf32>
    %84 = tpu.reciprocal %83 {approx = true} : vector<8x1xf32> -> vector<8x1xf32>
    %85 = vector.broadcast %84 : vector<8x1xf32> to vector<8x8xf32>
    %86 = arith.mulf %81, %85 : vector<8x8xf32>
    %cst_47 = arith.constant dense<0.000000e+00> : vector<8x8xf32>
    %87 = tpu.matmul %86, %70, %cst_47 {dimension_numbers = #tpu.dot_dimension_numbers<[1], [0], [0], [1], [0, 0, 1, 1], [], []>} : vector<8x8xf32>, vector<8x8xf32>, vector<8x8xf32> -> vector<8x8xf32>
    %c0_48 = arith.constant 0 : index
    %c2 = arith.constant 2 : index
    %c0_49 = arith.constant 0 : index
    %c0_50 = arith.constant 0 : index
    %88 = vector.load %arg5[%c0_48, %c2, %c0_49, %c0_50] : memref<1x4x8x32xf32, #tpu.memory_space<vmem>>, vector<1x1x8x32xf32>
    %89 = vector.shape_cast %88 : vector<1x1x8x32xf32> to vector<8x32xf32>
    %cst_51 = arith.constant dense<0.000000e+00> : vector<8x32xf32>
    %90 = tpu.matmul %87, %89, %cst_51 {dimension_numbers = #tpu.dot_dimension_numbers<[1], [0], [0], [1], [0, 0, 1, 1], [], []>} : vector<8x8xf32>, vector<8x32xf32>, vector<8x32xf32> -> vector<8x32xf32>
    %91 = arith.addf %67, %90 : vector<8x32xf32>
    %c0_52 = arith.constant 0 : index
    %c24 = arith.constant 24 : index
    %92 = vector.load %arg17[%c0_52, %c24] : memref<16x96xf32, #tpu.memory_space<vmem>>, vector<8x8xf32>
    %c0_53 = arith.constant 0 : index
    %c56 = arith.constant 56 : index
    %93 = vector.load %arg17[%c0_53, %c56] : memref<16x96xf32, #tpu.memory_space<vmem>>, vector<8x8xf32>
    %c0_54 = arith.constant 0 : index
    %c88 = arith.constant 88 : index
    %94 = vector.load %arg17[%c0_54, %c88] : memref<16x96xf32, #tpu.memory_space<vmem>>, vector<8x8xf32>
    %95 = tpu.transpose %93, [1, 0] : vector<8x8xf32> -> vector<8x8xf32>
    %cst_55 = arith.constant dense<0.000000e+00> : vector<8x8xf32>
    %96 = tpu.matmul %92, %95, %cst_55 {dimension_numbers = #tpu.dot_dimension_numbers<[1], [0], [0], [1], [0, 0, 1, 1], [], []>} : vector<8x8xf32>, vector<8x8xf32>, vector<8x8xf32> -> vector<8x8xf32>
    %cst_56 = arith.constant 0.353553385 : f32
    %97 = vector.broadcast %cst_56 : f32 to vector<8x8xf32>
    %98 = arith.mulf %96, %97 : vector<8x8xf32>
    %99 = vector.broadcast %18 : vector<1x8xf32> to vector<8x8xf32>
    %100 = arith.addf %98, %99 : vector<8x8xf32>
    %cst_57 = arith.constant dense<0xFF800000> : vector<8xf32>
    %101 = vector.multi_reduction <maximumf>, %100, %cst_57 [1] : vector<8x8xf32> to vector<8xf32>
    %102 = vector.shape_cast %101 : vector<8xf32> to vector<8x1xf32>
    %103 = vector.broadcast %102 : vector<8x1xf32> to vector<8x8xf32>
    %104 = arith.subf %100, %103 : vector<8x8xf32>
    %105 = math.exp %104 : vector<8x8xf32>
    %cst_58 = arith.constant dense<0.000000e+00> : vector<8xf32>
    %106 = vector.multi_reduction <add>, %105, %cst_58 [1] : vector<8x8xf32> to vector<8xf32>
    %107 = vector.shape_cast %106 : vector<8xf32> to vector<8x1xf32>
    %108 = tpu.reciprocal %107 {approx = true} : vector<8x1xf32> -> vector<8x1xf32>
    %109 = vector.broadcast %108 : vector<8x1xf32> to vector<8x8xf32>
    %110 = arith.mulf %105, %109 : vector<8x8xf32>
    %cst_59 = arith.constant dense<0.000000e+00> : vector<8x8xf32>
    %111 = tpu.matmul %110, %94, %cst_59 {dimension_numbers = #tpu.dot_dimension_numbers<[1], [0], [0], [1], [0, 0, 1, 1], [], []>} : vector<8x8xf32>, vector<8x8xf32>, vector<8x8xf32> -> vector<8x8xf32>
    %c0_60 = arith.constant 0 : index
    %c3 = arith.constant 3 : index
    %c0_61 = arith.constant 0 : index
    %c0_62 = arith.constant 0 : index
    %112 = vector.load %arg5[%c0_60, %c3, %c0_61, %c0_62] : memref<1x4x8x32xf32, #tpu.memory_space<vmem>>, vector<1x1x8x32xf32>
    %113 = vector.shape_cast %112 : vector<1x1x8x32xf32> to vector<8x32xf32>
    %cst_63 = arith.constant dense<0.000000e+00> : vector<8x32xf32>
    %114 = tpu.matmul %111, %113, %cst_63 {dimension_numbers = #tpu.dot_dimension_numbers<[1], [0], [0], [1], [0, 0, 1, 1], [], []>} : vector<8x8xf32>, vector<8x32xf32>, vector<8x32xf32> -> vector<8x32xf32>
    %115 = arith.addf %91, %114 : vector<8x32xf32>
    %c0_64 = arith.constant 0 : index
    %c0_65 = arith.constant 0 : index
    %c0_66 = arith.constant 0 : index
    %116 = vector.load %arg6[%c0_64, %c0_65, %c0_66] : memref<1x1x32xf32, #tpu.memory_space<vmem>>, vector<1x1x32xf32>
    %117 = vector.shape_cast %116 : vector<1x1x32xf32> to vector<1x32xf32>
    %118 = vector.broadcast %117 : vector<1x32xf32> to vector<8x32xf32>
    %119 = arith.addf %115, %118 : vector<8x32xf32>
    %c0_67 = arith.constant 0 : index
    %c0_68 = arith.constant 0 : index
    %120 = vector.load %arg18[%c0_67, %c0_68] : memref<16x32xf32, #tpu.memory_space<vmem>>, vector<8x32xf32>
    tpu.vector_store %arg18[%c0_67, %c0_68], %119 {strides = array<i32>} : memref<16x32xf32, #tpu.memory_space<vmem>>, vector<8x32xf32>,
    %c1_69 = arith.constant 1 : index
    %121 = memref.load %arg1[%c1_69] : memref<2xi32, #tpu.memory_space<smem>>
    %122 = vector.broadcast %121 : i32 to vector<1x8xi32>
    %123 = arith.cmpi sge, %12, %122 : vector<1x8xi32>
    %cst_70 = arith.constant -1.000000e+30 : f32
    %cst_71 = arith.constant 0.000000e+00 : f32
    %124 = vector.broadcast %cst_70 : f32 to vector<1x8xf32>
    %125 = vector.broadcast %cst_71 : f32 to vector<1x8xf32>
    %126 = arith.select %123, %124, %125 : vector<1x8xi1>, vector<1x8xf32>
    %cst_72 = arith.constant 0.000000e+00 : f32
    %127 = vector.broadcast %cst_72 : f32 to vector<8x32xf32>
    %c8_73 = arith.constant 8 : index
    %c0_74 = arith.constant 0 : index
    %128 = vector.load %arg17[%c8_73, %c0_74] : memref<16x96xf32, #tpu.memory_space<vmem>>, vector<8x8xf32>
    %c8_75 = arith.constant 8 : index
    %c32_76 = arith.constant 32 : index
    %129 = vector.load %arg17[%c8_75, %c32_76] : memref<16x96xf32, #tpu.memory_space<vmem>>, vector<8x8xf32>
    %c8_77 = arith.constant 8 : index
    %c64_78 = arith.constant 64 : index
    %130 = vector.load %arg17[%c8_77, %c64_78] : memref<16x96xf32, #tpu.memory_space<vmem>>, vector<8x8xf32>
    %131 = tpu.transpose %129, [1, 0] : vector<8x8xf32> -> vector<8x8xf32>
    %cst_79 = arith.constant dense<0.000000e+00> : vector<8x8xf32>
    %132 = tpu.matmul %128, %131, %cst_79 {dimension_numbers = #tpu.dot_dimension_numbers<[1], [0], [0], [1], [0, 0, 1, 1], [], []>} : vector<8x8xf32>, vector<8x8xf32>, vector<8x8xf32> -> vector<8x8xf32>
    %cst_80 = arith.constant 0.353553385 : f32
    %133 = vector.broadcast %cst_80 : f32 to vector<8x8xf32>
    %134 = arith.mulf %132, %133 : vector<8x8xf32>
    %135 = vector.broadcast %126 : vector<1x8xf32> to vector<8x8xf32>
    %136 = arith.addf %134, %135 : vector<8x8xf32>
    %cst_81 = arith.constant dense<0xFF800000> : vector<8xf32>
    %137 = vector.multi_reduction <maximumf>, %136, %cst_81 [1] : vector<8x8xf32> to vector<8xf32>
    %138 = vector.shape_cast %137 : vector<8xf32> to vector<8x1xf32>
    %139 = vector.broadcast %138 : vector<8x1xf32> to vector<8x8xf32>
    %140 = arith.subf %136, %139 : vector<8x8xf32>
    %141 = math.exp %140 : vector<8x8xf32>
    %cst_82 = arith.constant dense<0.000000e+00> : vector<8xf32>
    %142 = vector.multi_reduction <add>, %141, %cst_82 [1] : vector<8x8xf32> to vector<8xf32>
    %143 = vector.shape_cast %142 : vector<8xf32> to vector<8x1xf32>
    %144 = tpu.reciprocal %143 {approx = true} : vector<8x1xf32> -> vector<8x1xf32>
    %145 = vector.broadcast %144 : vector<8x1xf32> to vector<8x8xf32>
    %146 = arith.mulf %141, %145 : vector<8x8xf32>
    %cst_83 = arith.constant dense<0.000000e+00> : vector<8x8xf32>
    %147 = tpu.matmul %146, %130, %cst_83 {dimension_numbers = #tpu.dot_dimension_numbers<[1], [0], [0], [1], [0, 0, 1, 1], [], []>} : vector<8x8xf32>, vector<8x8xf32>, vector<8x8xf32> -> vector<8x8xf32>
    %c0_84 = arith.constant 0 : index
    %c0_85 = arith.constant 0 : index
    %c0_86 = arith.constant 0 : index
    %c0_87 = arith.constant 0 : index
    %148 = vector.load %arg5[%c0_84, %c0_85, %c0_86, %c0_87] : memref<1x4x8x32xf32, #tpu.memory_space<vmem>>, vector<1x1x8x32xf32>
    %149 = vector.shape_cast %148 : vector<1x1x8x32xf32> to vector<8x32xf32>
    %cst_88 = arith.constant dense<0.000000e+00> : vector<8x32xf32>
    %150 = tpu.matmul %147, %149, %cst_88 {dimension_numbers = #tpu.dot_dimension_numbers<[1], [0], [0], [1], [0, 0, 1, 1], [], []>} : vector<8x8xf32>, vector<8x32xf32>, vector<8x32xf32> -> vector<8x32xf32>
    %151 = arith.addf %127, %150 : vector<8x32xf32>
    %c8_89 = arith.constant 8 : index
    %c8_90 = arith.constant 8 : index
    %152 = vector.load %arg17[%c8_89, %c8_90] : memref<16x96xf32, #tpu.memory_space<vmem>>, vector<8x8xf32>
    %c8_91 = arith.constant 8 : index
    %c40_92 = arith.constant 40 : index
    %153 = vector.load %arg17[%c8_91, %c40_92] : memref<16x96xf32, #tpu.memory_space<vmem>>, vector<8x8xf32>
    %c8_93 = arith.constant 8 : index
    %c72_94 = arith.constant 72 : index
    %154 = vector.load %arg17[%c8_93, %c72_94] : memref<16x96xf32, #tpu.memory_space<vmem>>, vector<8x8xf32>
    %155 = tpu.transpose %153, [1, 0] : vector<8x8xf32> -> vector<8x8xf32>
    %cst_95 = arith.constant dense<0.000000e+00> : vector<8x8xf32>
    %156 = tpu.matmul %152, %155, %cst_95 {dimension_numbers = #tpu.dot_dimension_numbers<[1], [0], [0], [1], [0, 0, 1, 1], [], []>} : vector<8x8xf32>, vector<8x8xf32>, vector<8x8xf32> -> vector<8x8xf32>
    %cst_96 = arith.constant 0.353553385 : f32
    %157 = vector.broadcast %cst_96 : f32 to vector<8x8xf32>
    %158 = arith.mulf %156, %157 : vector<8x8xf32>
    %159 = vector.broadcast %126 : vector<1x8xf32> to vector<8x8xf32>
    %160 = arith.addf %158, %159 : vector<8x8xf32>
    %cst_97 = arith.constant dense<0xFF800000> : vector<8xf32>
    %161 = vector.multi_reduction <maximumf>, %160, %cst_97 [1] : vector<8x8xf32> to vector<8xf32>
    %162 = vector.shape_cast %161 : vector<8xf32> to vector<8x1xf32>
    %163 = vector.broadcast %162 : vector<8x1xf32> to vector<8x8xf32>
    %164 = arith.subf %160, %163 : vector<8x8xf32>
    %165 = math.exp %164 : vector<8x8xf32>
    %cst_98 = arith.constant dense<0.000000e+00> : vector<8xf32>
    %166 = vector.multi_reduction <add>, %165, %cst_98 [1] : vector<8x8xf32> to vector<8xf32>
    %167 = vector.shape_cast %166 : vector<8xf32> to vector<8x1xf32>
    %168 = tpu.reciprocal %167 {approx = true} : vector<8x1xf32> -> vector<8x1xf32>
    %169 = vector.broadcast %168 : vector<8x1xf32> to vector<8x8xf32>
    %170 = arith.mulf %165, %169 : vector<8x8xf32>
    %cst_99 = arith.constant dense<0.000000e+00> : vector<8x8xf32>
    %171 = tpu.matmul %170, %154, %cst_99 {dimension_numbers = #tpu.dot_dimension_numbers<[1], [0], [0], [1], [0, 0, 1, 1], [], []>} : vector<8x8xf32>, vector<8x8xf32>, vector<8x8xf32> -> vector<8x8xf32>
    %c0_100 = arith.constant 0 : index
    %c1_101 = arith.constant 1 : index
    %c0_102 = arith.constant 0 : index
    %c0_103 = arith.constant 0 : index
    %172 = vector.load %arg5[%c0_100, %c1_101, %c0_102, %c0_103] : memref<1x4x8x32xf32, #tpu.memory_space<vmem>>, vector<1x1x8x32xf32>
    %173 = vector.shape_cast %172 : vector<1x1x8x32xf32> to vector<8x32xf32>
    %cst_104 = arith.constant dense<0.000000e+00> : vector<8x32xf32>
    %174 = tpu.matmul %171, %173, %cst_104 {dimension_numbers = #tpu.dot_dimension_numbers<[1], [0], [0], [1], [0, 0, 1, 1], [], []>} : vector<8x8xf32>, vector<8x32xf32>, vector<8x32xf32> -> vector<8x32xf32>
    %175 = arith.addf %151, %174 : vector<8x32xf32>
    %c8_105 = arith.constant 8 : index
    %c16_106 = arith.constant 16 : index
    %176 = vector.load %arg17[%c8_105, %c16_106] : memref<16x96xf32, #tpu.memory_space<vmem>>, vector<8x8xf32>
    %c8_107 = arith.constant 8 : index
    %c48_108 = arith.constant 48 : index
    %177 = vector.load %arg17[%c8_107, %c48_108] : memref<16x96xf32, #tpu.memory_space<vmem>>, vector<8x8xf32>
    %c8_109 = arith.constant 8 : index
    %c80_110 = arith.constant 80 : index
    %178 = vector.load %arg17[%c8_109, %c80_110] : memref<16x96xf32, #tpu.memory_space<vmem>>, vector<8x8xf32>
    %179 = tpu.transpose %177, [1, 0] : vector<8x8xf32> -> vector<8x8xf32>
    %cst_111 = arith.constant dense<0.000000e+00> : vector<8x8xf32>
    %180 = tpu.matmul %176, %179, %cst_111 {dimension_numbers = #tpu.dot_dimension_numbers<[1], [0], [0], [1], [0, 0, 1, 1], [], []>} : vector<8x8xf32>, vector<8x8xf32>, vector<8x8xf32> -> vector<8x8xf32>
    %cst_112 = arith.constant 0.353553385 : f32
    %181 = vector.broadcast %cst_112 : f32 to vector<8x8xf32>
    %182 = arith.mulf %180, %181 : vector<8x8xf32>
    %183 = vector.broadcast %126 : vector<1x8xf32> to vector<8x8xf32>
    %184 = arith.addf %182, %183 : vector<8x8xf32>
    %cst_113 = arith.constant dense<0xFF800000> : vector<8xf32>
    %185 = vector.multi_reduction <maximumf>, %184, %cst_113 [1] : vector<8x8xf32> to vector<8xf32>
    %186 = vector.shape_cast %185 : vector<8xf32> to vector<8x1xf32>
    %187 = vector.broadcast %186 : vector<8x1xf32> to vector<8x8xf32>
    %188 = arith.subf %184, %187 : vector<8x8xf32>
    %189 = math.exp %188 : vector<8x8xf32>
    %cst_114 = arith.constant dense<0.000000e+00> : vector<8xf32>
    %190 = vector.multi_reduction <add>, %189, %cst_114 [1] : vector<8x8xf32> to vector<8xf32>
    %191 = vector.shape_cast %190 : vector<8xf32> to vector<8x1xf32>
    %192 = tpu.reciprocal %191 {approx = true} : vector<8x1xf32> -> vector<8x1xf32>
    %193 = vector.broadcast %192 : vector<8x1xf32> to vector<8x8xf32>
    %194 = arith.mulf %189, %193 : vector<8x8xf32>
    %cst_115 = arith.constant dense<0.000000e+00> : vector<8x8xf32>
    %195 = tpu.matmul %194, %178, %cst_115 {dimension_numbers = #tpu.dot_dimension_numbers<[1], [0], [0], [1], [0, 0, 1, 1], [], []>} : vector<8x8xf32>, vector<8x8xf32>, vector<8x8xf32> -> vector<8x8xf32>
    %c0_116 = arith.constant 0 : index
    %c2_117 = arith.constant 2 : index
    %c0_118 = arith.constant 0 : index
    %c0_119 = arith.constant 0 : index
    %196 = vector.load %arg5[%c0_116, %c2_117, %c0_118, %c0_119] : memref<1x4x8x32xf32, #tpu.memory_space<vmem>>, vector<1x1x8x32xf32>
    %197 = vector.shape_cast %196 : vector<1x1x8x32xf32> to vector<8x32xf32>
    %cst_120 = arith.constant dense<0.000000e+00> : vector<8x32xf32>
    %198 = tpu.matmul %195, %197, %cst_120 {dimension_numbers = #tpu.dot_dimension_numbers<[1], [0], [0], [1], [0, 0, 1, 1], [], []>} : vector<8x8xf32>, vector<8x32xf32>, vector<8x32xf32> -> vector<8x32xf32>
    %199 = arith.addf %175, %198 : vector<8x32xf32>
    %c8_121 = arith.constant 8 : index
    %c24_122 = arith.constant 24 : index
    %200 = vector.load %arg17[%c8_121, %c24_122] : memref<16x96xf32, #tpu.memory_space<vmem>>, vector<8x8xf32>
    %c8_123 = arith.constant 8 : index
    %c56_124 = arith.constant 56 : index
    %201 = vector.load %arg17[%c8_123, %c56_124] : memref<16x96xf32, #tpu.memory_space<vmem>>, vector<8x8xf32>
    %c8_125 = arith.constant 8 : index
    %c88_126 = arith.constant 88 : index
    %202 = vector.load %arg17[%c8_125, %c88_126] : memref<16x96xf32, #tpu.memory_space<vmem>>, vector<8x8xf32>
    %203 = tpu.transpose %201, [1, 0] : vector<8x8xf32> -> vector<8x8xf32>
    %cst_127 = arith.constant dense<0.000000e+00> : vector<8x8xf32>
    %204 = tpu.matmul %200, %203, %cst_127 {dimension_numbers = #tpu.dot_dimension_numbers<[1], [0], [0], [1], [0, 0, 1, 1], [], []>} : vector<8x8xf32>, vector<8x8xf32>, vector<8x8xf32> -> vector<8x8xf32>
    %cst_128 = arith.constant 0.353553385 : f32
    %205 = vector.broadcast %cst_128 : f32 to vector<8x8xf32>
    %206 = arith.mulf %204, %205 : vector<8x8xf32>
    %207 = vector.broadcast %126 : vector<1x8xf32> to vector<8x8xf32>
    %208 = arith.addf %206, %207 : vector<8x8xf32>
    %cst_129 = arith.constant dense<0xFF800000> : vector<8xf32>
    %209 = vector.multi_reduction <maximumf>, %208, %cst_129 [1] : vector<8x8xf32> to vector<8xf32>
    %210 = vector.shape_cast %209 : vector<8xf32> to vector<8x1xf32>
    %211 = vector.broadcast %210 : vector<8x1xf32> to vector<8x8xf32>
    %212 = arith.subf %208, %211 : vector<8x8xf32>
    %213 = math.exp %212 : vector<8x8xf32>
    %cst_130 = arith.constant dense<0.000000e+00> : vector<8xf32>
    %214 = vector.multi_reduction <add>, %213, %cst_130 [1] : vector<8x8xf32> to vector<8xf32>
    %215 = vector.shape_cast %214 : vector<8xf32> to vector<8x1xf32>
    %216 = tpu.reciprocal %215 {approx = true} : vector<8x1xf32> -> vector<8x1xf32>
    %217 = vector.broadcast %216 : vector<8x1xf32> to vector<8x8xf32>
    %218 = arith.mulf %213, %217 : vector<8x8xf32>
    %cst_131 = arith.constant dense<0.000000e+00> : vector<8x8xf32>
    %219 = tpu.matmul %218, %202, %cst_131 {dimension_numbers = #tpu.dot_dimension_numbers<[1], [0], [0], [1], [0, 0, 1, 1], [], []>} : vector<8x8xf32>, vector<8x8xf32>, vector<8x8xf32> -> vector<8x8xf32>
    %c0_132 = arith.constant 0 : index
    %c3_133 = arith.constant 3 : index
    %c0_134 = arith.constant 0 : index
    %c0_135 = arith.constant 0 : index
    %220 = vector.load %arg5[%c0_132, %c3_133, %c0_134, %c0_135] : memref<1x4x8x32xf32, #tpu.memory_space<vmem>>, vector<1x1x8x32xf32>
    %221 = vector.shape_cast %220 : vector<1x1x8x32xf32> to vector<8x32xf32>
    %cst_136 = arith.constant dense<0.000000e+00> : vector<8x32xf32>
    %222 = tpu.matmul %219, %221, %cst_136 {dimension_numbers = #tpu.dot_dimension_numbers<[1], [0], [0], [1], [0, 0, 1, 1], [], []>} : vector<8x8xf32>, vector<8x32xf32>, vector<8x32xf32> -> vector<8x32xf32>
    %223 = arith.addf %199, %222 : vector<8x32xf32>
    %c0_137 = arith.constant 0 : index
    %c0_138 = arith.constant 0 : index
    %c0_139 = arith.constant 0 : index
    %224 = vector.load %arg6[%c0_137, %c0_138, %c0_139] : memref<1x1x32xf32, #tpu.memory_space<vmem>>, vector<1x1x32xf32>
    %225 = vector.shape_cast %224 : vector<1x1x32xf32> to vector<1x32xf32>
    %226 = vector.broadcast %225 : vector<1x32xf32> to vector<8x32xf32>
    %227 = arith.addf %223, %226 : vector<8x32xf32>
    %c8_140 = arith.constant 8 : index
    %c0_141 = arith.constant 0 : index
    %228 = vector.load %arg18[%c8_140, %c0_141] : memref<16x32xf32, #tpu.memory_space<vmem>>, vector<8x32xf32>
    tpu.vector_store %arg18[%c8_140, %c0_141], %227 {strides = array<i32>} : memref<16x32xf32, #tpu.memory_space<vmem>>, vector<8x32xf32>,
    %c0_142 = arith.constant 0 : index
    %c0_143 = arith.constant 0 : index
    %229 = vector.load %arg18[%c0_142, %c0_143] : memref<16x32xf32, #tpu.memory_space<vmem>>, vector<16x32xf32>
    %230 = arith.addf %3, %229 : vector<16x32xf32>
    %c0_144 = arith.constant 0 : index
    %c0_145 = arith.constant 0 : index
    %c0_146 = arith.constant 0 : index
    %231 = vector.load %arg11[%c0_144, %c0_145, %c0_146] : memref<1x1x32xf32, #tpu.memory_space<vmem>>, vector<1x1x32xf32>
    %232 = vector.shape_cast %231 : vector<1x1x32xf32> to vector<1x32xf32>
    %c0_147 = arith.constant 0 : index
    %c0_148 = arith.constant 0 : index
    %c0_149 = arith.constant 0 : index
    %233 = vector.load %arg12[%c0_147, %c0_148, %c0_149] : memref<1x1x32xf32, #tpu.memory_space<vmem>>, vector<1x1x32xf32>
    %234 = vector.shape_cast %233 : vector<1x1x32xf32> to vector<1x32xf32>
    %cst_150 = arith.constant dense<0.000000e+00> : vector<16xf32>
    %235 = vector.multi_reduction <add>, %230, %cst_150 [1] : vector<16x32xf32> to vector<16xf32>
    %236 = vector.shape_cast %235 : vector<16xf32> to vector<16x1xf32>
    %cst_151 = arith.constant 3.200000e+01 : f32
    %237 = vector.broadcast %cst_151 : f32 to vector<16x1xf32>
    %238 = arith.divf %236, %237 : vector<16x1xf32>
    %239 = vector.broadcast %238 : vector<16x1xf32> to vector<16x32xf32>
    %240 = arith.subf %230, %239 : vector<16x32xf32>
    %241 = arith.mulf %240, %240 : vector<16x32xf32>
    %cst_152 = arith.constant dense<0.000000e+00> : vector<16xf32>
    %242 = vector.multi_reduction <add>, %241, %cst_152 [1] : vector<16x32xf32> to vector<16xf32>
    %243 = vector.shape_cast %242 : vector<16xf32> to vector<16x1xf32>
    %cst_153 = arith.constant 3.200000e+01 : f32
    %244 = vector.broadcast %cst_153 : f32 to vector<16x1xf32>
    %245 = arith.divf %243, %244 : vector<16x1xf32>
    %246 = vector.broadcast %238 : vector<16x1xf32> to vector<16x32xf32>
    %247 = arith.subf %230, %246 : vector<16x32xf32>
    %cst_154 = arith.constant 9.99999974E-6 : f32
    %248 = vector.broadcast %cst_154 : f32 to vector<16x1xf32>
    %249 = arith.addf %245, %248 : vector<16x1xf32>
    %250 = math.rsqrt %249 : vector<16x1xf32>
    %251 = vector.broadcast %250 : vector<16x1xf32> to vector<16x32xf32>
    %252 = arith.mulf %247, %251 : vector<16x32xf32>
    %253 = vector.broadcast %232 : vector<1x32xf32> to vector<16x32xf32>
    %254 = arith.mulf %252, %253 : vector<16x32xf32>
    %255 = vector.broadcast %234 : vector<1x32xf32> to vector<16x32xf32>
    %256 = arith.addf %254, %255 : vector<16x32xf32>
    %c0_155 = arith.constant 0 : index
    %c0_156 = arith.constant 0 : index
    %c0_157 = arith.constant 0 : index
    %257 = vector.load %arg7[%c0_155, %c0_156, %c0_157] : memref<1x32x32xf32, #tpu.memory_space<vmem>>, vector<1x32x32xf32>
    %258 = vector.shape_cast %257 : vector<1x32x32xf32> to vector<32x32xf32>
    %cst_158 = arith.constant dense<0.000000e+00> : vector<16x32xf32>
    %259 = tpu.matmul %256, %258, %cst_158 {dimension_numbers = #tpu.dot_dimension_numbers<[1], [0], [0], [1], [0, 0, 1, 1], [], []>} : vector<16x32xf32>, vector<32x32xf32>, vector<16x32xf32> -> vector<16x32xf32>
    %c0_159 = arith.constant 0 : index
    %c0_160 = arith.constant 0 : index
    %c0_161 = arith.constant 0 : index
    %260 = vector.load %arg8[%c0_159, %c0_160, %c0_161] : memref<1x1x32xf32, #tpu.memory_space<vmem>>, vector<1x1x32xf32>
    %261 = vector.shape_cast %260 : vector<1x1x32xf32> to vector<1x32xf32>
    %262 = vector.broadcast %261 : vector<1x32xf32> to vector<16x32xf32>
    %263 = arith.addf %259, %262 : vector<16x32xf32>
    %cst_162 = arith.constant 0.000000e+00 : f32
    %264 = vector.broadcast %cst_162 : f32 to vector<16x32xf32>
    %265 = arith.maximumf %263, %264 : vector<16x32xf32>
    %c0_163 = arith.constant 0 : index
    %c0_164 = arith.constant 0 : index
    %c0_165 = arith.constant 0 : index
    %266 = vector.load %arg9[%c0_163, %c0_164, %c0_165] : memref<1x32x32xf32, #tpu.memory_space<vmem>>, vector<1x32x32xf32>
    %267 = vector.shape_cast %266 : vector<1x32x32xf32> to vector<32x32xf32>
    %cst_166 = arith.constant dense<0.000000e+00> : vector<16x32xf32>
    %268 = tpu.matmul %265, %267, %cst_166 {dimension_numbers = #tpu.dot_dimension_numbers<[1], [0], [0], [1], [0, 0, 1, 1], [], []>} : vector<16x32xf32>, vector<32x32xf32>, vector<16x32xf32> -> vector<16x32xf32>
    %c0_167 = arith.constant 0 : index
    %c0_168 = arith.constant 0 : index
    %c0_169 = arith.constant 0 : index
    %269 = vector.load %arg10[%c0_167, %c0_168, %c0_169] : memref<1x1x32xf32, #tpu.memory_space<vmem>>, vector<1x1x32xf32>
    %270 = vector.shape_cast %269 : vector<1x1x32xf32> to vector<1x32xf32>
    %271 = vector.broadcast %270 : vector<1x32xf32> to vector<16x32xf32>
    %272 = arith.addf %268, %271 : vector<16x32xf32>
    %273 = arith.addf %256, %272 : vector<16x32xf32>
    %c0_170 = arith.constant 0 : index
    %c0_171 = arith.constant 0 : index
    %c0_172 = arith.constant 0 : index
    %274 = vector.load %arg13[%c0_170, %c0_171, %c0_172] : memref<1x1x32xf32, #tpu.memory_space<vmem>>, vector<1x1x32xf32>
    %275 = vector.shape_cast %274 : vector<1x1x32xf32> to vector<1x32xf32>
    %c0_173 = arith.constant 0 : index
    %c0_174 = arith.constant 0 : index
    %c0_175 = arith.constant 0 : index
    %276 = vector.load %arg14[%c0_173, %c0_174, %c0_175] : memref<1x1x32xf32, #tpu.memory_space<vmem>>, vector<1x1x32xf32>
    %277 = vector.shape_cast %276 : vector<1x1x32xf32> to vector<1x32xf32>
    %cst_176 = arith.constant dense<0.000000e+00> : vector<16xf32>
    %278 = vector.multi_reduction <add>, %273, %cst_176 [1] : vector<16x32xf32> to vector<16xf32>
    %279 = vector.shape_cast %278 : vector<16xf32> to vector<16x1xf32>
    %cst_177 = arith.constant 3.200000e+01 : f32
    %280 = vector.broadcast %cst_177 : f32 to vector<16x1xf32>
    %281 = arith.divf %279, %280 : vector<16x1xf32>
    %282 = vector.broadcast %281 : vector<16x1xf32> to vector<16x32xf32>
    %283 = arith.subf %273, %282 : vector<16x32xf32>
    %284 = arith.mulf %283, %283 : vector<16x32xf32>
    %cst_178 = arith.constant dense<0.000000e+00> : vector<16xf32>
    %285 = vector.multi_reduction <add>, %284, %cst_178 [1] : vector<16x32xf32> to vector<16xf32>
    %286 = vector.shape_cast %285 : vector<16xf32> to vector<16x1xf32>
    %cst_179 = arith.constant 3.200000e+01 : f32
    %287 = vector.broadcast %cst_179 : f32 to vector<16x1xf32>
    %288 = arith.divf %286, %287 : vector<16x1xf32>
    %289 = vector.broadcast %281 : vector<16x1xf32> to vector<16x32xf32>
    %290 = arith.subf %273, %289 : vector<16x32xf32>
    %cst_180 = arith.constant 9.99999974E-6 : f32
    %291 = vector.broadcast %cst_180 : f32 to vector<16x1xf32>
    %292 = arith.addf %288, %291 : vector<16x1xf32>
    %293 = math.rsqrt %292 : vector<16x1xf32>
    %294 = vector.broadcast %293 : vector<16x1xf32> to vector<16x32xf32>
    %295 = arith.mulf %290, %294 : vector<16x32xf32>
    %296 = vector.broadcast %275 : vector<1x32xf32> to vector<16x32xf32>
    %297 = arith.mulf %295, %296 : vector<16x32xf32>
    %298 = vector.broadcast %277 : vector<1x32xf32> to vector<16x32xf32>
    %299 = arith.addf %297, %298 : vector<16x32xf32>
    %c0_181 = arith.constant 0 : index
    %c0_182 = arith.constant 0 : index
    %300 = vector.load %arg16[%c0_181, %c0_182] : memref<16x32xf32, #tpu.memory_space<vmem>>, vector<16x32xf32>
    tpu.vector_store %arg16[%c0_181, %c0_182], %299 {strides = array<i32>} : memref<16x32xf32, #tpu.memory_space<vmem>>, vector<16x32xf32>,
    %c1_i32 = arith.constant 1 : i32
    %301 = arith.cmpi eq, %arg0, %c1_i32 : i32
    %302 = arith.extui %301 : i1 to i32
    %c0_i32_183 = arith.constant 0 : i32
    %303 = arith.cmpi ne, %302, %c0_i32_183 : i32
    scf.if %303 {
      %304 = tpu.iota {dimensions = array<i32: 0>} : vector<8x1xi32>
      %c0_184 = arith.constant 0 : index
      %305 = memref.load %arg1[%c0_184] : memref<2xi32, #tpu.memory_space<smem>>
      %306 = vector.broadcast %305 : i32 to vector<8x1xi32>
      %307 = arith.cmpi slt, %304, %306 : vector<8x1xi32>
      %308 = arith.extui %307 : vector<8x1xi1> to vector<8x1xi32>
      %309 = arith.sitofp %308 : vector<8x1xi32> to vector<8x1xf32>
      %c0_185 = arith.constant 0 : index
      %c0_186 = arith.constant 0 : index
      %310 = vector.load %arg16[%c0_185, %c0_186] : memref<16x32xf32, #tpu.memory_space<vmem>>, vector<8x32xf32>
      %311 = vector.broadcast %309 : vector<8x1xf32> to vector<8x32xf32>
      %312 = arith.mulf %310, %311 : vector<8x32xf32>
      %cst_187 = arith.constant dense<0.000000e+00> : vector<32xf32>
      %313 = vector.multi_reduction <add>, %312, %cst_187 [0] : vector<8x32xf32> to vector<32xf32>
      %314 = vector.shape_cast %313 : vector<32xf32> to vector<1x32xf32>
      %c1_i32_188 = arith.constant 1 : i32
      %315 = arith.addi %305, %c1_i32_188 : i32
      %316 = arith.sitofp %315 : i32 to f32
      %317 = vector.broadcast %316 : f32 to vector<1x32xf32>
      %318 = arith.divf %314, %317 : vector<1x32xf32>
      %c0_189 = arith.constant 0 : index
      %c0_190 = arith.constant 0 : index
      %319 = vector.load %arg15[%c0_189, %c0_190] : memref<2x32xf32, #tpu.memory_space<vmem>>, vector<1x32xf32>
      tpu.vector_store %arg15[%c0_189, %c0_190], %318 {strides = array<i32>} : memref<2x32xf32, #tpu.memory_space<vmem>>, vector<1x32xf32>,
      %c1_191 = arith.constant 1 : index
      %320 = memref.load %arg1[%c1_191] : memref<2xi32, #tpu.memory_space<smem>>
      %321 = vector.broadcast %320 : i32 to vector<8x1xi32>
      %322 = arith.cmpi slt, %304, %321 : vector<8x1xi32>
      %323 = arith.extui %322 : vector<8x1xi1> to vector<8x1xi32>
      %324 = arith.sitofp %323 : vector<8x1xi32> to vector<8x1xf32>
      %c8_192 = arith.constant 8 : index
      %c0_193 = arith.constant 0 : index
      %325 = vector.load %arg16[%c8_192, %c0_193] : memref<16x32xf32, #tpu.memory_space<vmem>>, vector<8x32xf32>
      %326 = vector.broadcast %324 : vector<8x1xf32> to vector<8x32xf32>
      %327 = arith.mulf %325, %326 : vector<8x32xf32>
      %cst_194 = arith.constant dense<0.000000e+00> : vector<32xf32>
      %328 = vector.multi_reduction <add>, %327, %cst_194 [0] : vector<8x32xf32> to vector<32xf32>
      %329 = vector.shape_cast %328 : vector<32xf32> to vector<1x32xf32>
      %c1_i32_195 = arith.constant 1 : i32
      %330 = arith.addi %320, %c1_i32_195 : i32
      %331 = arith.sitofp %330 : i32 to f32
      %332 = vector.broadcast %331 : f32 to vector<1x32xf32>
      %333 = arith.divf %329, %332 : vector<1x32xf32>
      %c1_196 = arith.constant 1 : index
      %c0_197 = arith.constant 0 : index
      %334 = vector.load %arg15[%c1_196, %c0_197] : memref<2x32xf32, #tpu.memory_space<vmem>>, vector<1x32xf32>
      tpu.vector_store %arg15[%c1_196, %c0_197], %333 {strides = array<i32>} : memref<2x32xf32, #tpu.memory_space<vmem>>, vector<1x32xf32>,
    } else {
    }
    return
  }
  func.func @transform_0(%arg0: i32, %arg1: memref<2xi32, #tpu.memory_space<smem>>) -> (i32, i32) {
    %c0_i32 = arith.constant 0 : i32
    %c0_i32_0 = arith.constant 0 : i32
    %c0_i32_1 = arith.constant 0 : i32
    return %c0_i32, %c0_i32_0 : i32, i32
  }
  func.func @transform_1(%arg0: i32, %arg1: memref<2xi32, #tpu.memory_space<smem>>) -> (i32, i32, i32) {
    %c0_i32 = arith.constant 0 : i32
    %c0_i32_0 = arith.constant 0 : i32
    %c0_i32_1 = arith.constant 0 : i32
    return %arg0, %c0_i32, %c0_i32_0 : i32, i32, i32
  }
  func.func @transform_2(%arg0: i32, %arg1: memref<2xi32, #tpu.memory_space<smem>>) -> (i32, i32, i32) {
    %c0_i32 = arith.constant 0 : i32
    %c0_i32_0 = arith.constant 0 : i32
    %c0_i32_1 = arith.constant 0 : i32
    return %arg0, %c0_i32, %c0_i32_0 : i32, i32, i32
  }
  func.func @transform_3(%arg0: i32, %arg1: memref<2xi32, #tpu.memory_space<smem>>) -> (i32, i32, i32, i32) {
    %c0_i32 = arith.constant 0 : i32
    %c0_i32_0 = arith.constant 0 : i32
    %c0_i32_1 = arith.constant 0 : i32
    %c0_i32_2 = arith.constant 0 : i32
    return %arg0, %c0_i32, %c0_i32_0, %c0_i32_1 : i32, i32, i32, i32
  }
  func.func @transform_4(%arg0: i32, %arg1: memref<2xi32, #tpu.memory_space<smem>>) -> (i32, i32, i32) {
    %c0_i32 = arith.constant 0 : i32
    %c0_i32_0 = arith.constant 0 : i32
    %c0_i32_1 = arith.constant 0 : i32
    return %arg0, %c0_i32, %c0_i32_0 : i32, i32, i32
  }
  func.func @transform_5(%arg0: i32, %arg1: memref<2xi32, #tpu.memory_space<smem>>) -> (i32, i32, i32) {
    %c0_i32 = arith.constant 0 : i32
    %c0_i32_0 = arith.constant 0 : i32
    %c0_i32_1 = arith.constant 0 : i32
    return %arg0, %c0_i32, %c0_i32_0 : i32, i32, i32
  }
  func.func @transform_6(%arg0: i32, %arg1: memref<2xi32, #tpu.memory_space<smem>>) -> (i32, i32, i32) {
    %c0_i32 = arith.constant 0 : i32
    %c0_i32_0 = arith.constant 0 : i32
    %c0_i32_1 = arith.constant 0 : i32
    return %arg0, %c0_i32, %c0_i32_0 : i32, i32, i32
  }
  func.func @transform_7(%arg0: i32, %arg1: memref<2xi32, #tpu.memory_space<smem>>) -> (i32, i32, i32) {
    %c0_i32 = arith.constant 0 : i32
    %c0_i32_0 = arith.constant 0 : i32
    %c0_i32_1 = arith.constant 0 : i32
    return %arg0, %c0_i32, %c0_i32_0 : i32, i32, i32
  }
  func.func @transform_8(%arg0: i32, %arg1: memref<2xi32, #tpu.memory_space<smem>>) -> (i32, i32, i32) {
    %c0_i32 = arith.constant 0 : i32
    %c0_i32_0 = arith.constant 0 : i32
    %c0_i32_1 = arith.constant 0 : i32
    return %arg0, %c0_i32, %c0_i32_0 : i32, i32, i32
  }
  func.func @transform_9(%arg0: i32, %arg1: memref<2xi32, #tpu.memory_space<smem>>) -> (i32, i32, i32) {
    %c0_i32 = arith.constant 0 : i32
    %c0_i32_0 = arith.constant 0 : i32
    %c0_i32_1 = arith.constant 0 : i32
    return %arg0, %c0_i32, %c0_i32_0 : i32, i32, i32
  }
  func.func @transform_10(%arg0: i32, %arg1: memref<2xi32, #tpu.memory_space<smem>>) -> (i32, i32, i32) {
    %c0_i32 = arith.constant 0 : i32
    %c0_i32_0 = arith.constant 0 : i32
    %c0_i32_1 = arith.constant 0 : i32
    return %arg0, %c0_i32, %c0_i32_0 : i32, i32, i32
  }
  func.func @transform_11(%arg0: i32, %arg1: memref<2xi32, #tpu.memory_space<smem>>) -> (i32, i32, i32) {
    %c0_i32 = arith.constant 0 : i32
    %c0_i32_0 = arith.constant 0 : i32
    %c0_i32_1 = arith.constant 0 : i32
    return %arg0, %c0_i32, %c0_i32_0 : i32, i32, i32
  }
  func.func @transform_12(%arg0: i32, %arg1: memref<2xi32, #tpu.memory_space<smem>>) -> (i32, i32, i32) {
    %c0_i32 = arith.constant 0 : i32
    %c0_i32_0 = arith.constant 0 : i32
    %c0_i32_1 = arith.constant 0 : i32
    return %arg0, %c0_i32, %c0_i32_0 : i32, i32, i32
  }
  func.func @transform_13(%arg0: i32, %arg1: memref<2xi32, #tpu.memory_space<smem>>) -> (i32, i32) {
    %c0_i32 = arith.constant 0 : i32
    %c0_i32_0 = arith.constant 0 : i32
    %c0_i32_1 = arith.constant 0 : i32
    return %c0_i32, %c0_i32_0 : i32, i32
  }
}

</mosaic_0001>

<bundles_post_ra>
// kernel: temporal_gt_forward.1
= control target key start
LH: loop header
LB: loop body
LE: loop exit
PB: predicated region body
PF: predicated region fallthrough
CT: control target
= control target key end

     0   :  { %s4541_s0 = inlined_call_operand.vmem [shape: s32[2], index: 0, kind: input, shape index: {}]   ;;  %s4542_s1 = inlined_call_operand.vmem [shape: f32[16,32], index: 1, kind: input, shape index: {}]   ;;  %s4543_s2 = inlined_call_operand.vmem [shape: f32[2,32,96], index: 2, kind: input, shape index: {}]   ;;  %s4544_s3 = inlined_call_operand.vmem [shape: f32[2,1,96], index: 3, kind: input, shape index: {}]   ;;  %s4545_s4 = inlined_call_operand.hbm [shape: f32[2,4,8,32], index: 4, kind: input, shape index: {}]   ;;  %s4546_s5 = inlined_call_operand.vmem [shape: f32[2,1,32], index: 5, kind: input, shape index: {}]   ;;  %s4547_s6 = inlined_call_operand.hbm [shape: f32[2,32,32], index: 6, kind: input, shape index: {}]   ;;  %s4548_s7 = inlined_call_operand.vmem [shape: f32[2,1,32], index: 7, kind: input, shape index: {}]   ;;  %s4549_s8 = inlined_call_operand.hbm [shape: f32[2,32,32], index: 8, kind: input, shape index: {}]   ;;  %s4550_s9 = inlined_call_operand.vmem [shape: f32[2,1,32], index: 9, kind: input, shape index: {}]   ;;  %s4551_s10 = inlined_call_operand.vmem [shape: f32[2,1,32], index: 10, kind: input, shape index: {}]   ;;  %s4552_s11 = inlined_call_operand.vmem [shape: f32[2,1,32], index: 11, kind: input, shape index: {}]   ;;  %s4553_s12 = inlined_call_operand.vmem [shape: f32[2,1,32], index: 12, kind: input, shape index: {}]   ;;  %s4554_s13 = inlined_call_operand.vmem [shape: f32[2,1,32], index: 13, kind: input, shape index: {}]   ;;  %s4555_s14 = inlined_call_operand.hbm [shape: f32[2,32], index: 14, kind: output, shape index: {}]  }
   0x1   :  { %4567 = sst [smem:[#allocation21_spill]] %s4542_s1  ;;  %s19_s15 = sshll.u32 %s4541_s0, 4  ;;  %s20_s15 = int_to_ptr.vmem [resolvable:$true] %s19_s15 }
   0x2   :  { %4568 = sst [smem:[#allocation22_spill]] %s4543_s2  ;;  %s3693_s16 = scalar_lea.vmem %s20_s15, 16 }
   0x3   :  { %4569 = sst [smem:[#allocation23_spill]] %s4545_s4  ;;  %p3694_p0 = scmp.ne.s32.totalorder %s20_s15, %s3693_s16 }
   0x4   :  { %4570 = sst [smem:[#allocation24_spill]] %s4547_s6  ;;  %p3698_p1 = scmp.lt.s32.totalorder %s20_s15, %s20_s15 }
   0x5   :  { %4571 = sst [smem:[#allocation25_spill]] %s4549_s8  ;;  %p3699_p2 = scmp.lt.s32.totalorder %s3693_s16, %s3693_s16 }
   0x6   :  { %4572 = sst [smem:[#allocation26_spill]] %s4552_s11 }
   0x7   :  { %4573 = sst [smem:[#allocation27_spill]] %s4553_s12  ;;  %p3700_p3 = por %p3699_p2, %p3698_p1 }
   0x8   :  { %4574 = sst [smem:[#allocation28_spill]] %s4554_s13 }
   0x9   :  { %4575 = sst [smem:[#allocation29_spill]] %s4555_s14  ;;  %p3701_p4 = pnand %p3700_p3, %p3694_p0 }
   0xb   :  { %3704 = shalt.err (!%p3701_p4)  }
   0xc   :  { %s3867_s17 = smov [#allocation6]  }
   0xd   :  { %22 = dma.vmem_to_smem %s20_s15, 16, %s3867_s17, [#allocation5] }
   0xe   :  { %3837 = dma.done.wait [#allocation5], 16 }
   0xf   :  { %3838 = vsyncadd [#allocation5], 4294967280 }
  0x10   :  { %24 = sfence }
  0x11   :  { %25 = vsyncpa [#allocation8], 0 }
  0x12   :  { %27 = vsyncpa [#allocation8 + $0x1], 0 }
  0x13   :  { %28 = vsyncpa [#allocation11], 0 }
  0x14   :  { %30 = vsyncpa [#allocation11 + $0x1], 0 }
  0x15   :  { %31 = vsyncpa [#allocation9], 0  ;;  %s3966_s18 = smov 0   ;;  %s3968_s0 = smov 0  }
  0x16   :  { %s3970_s19 = smov 0   ;;  %s3972_s20 = smov 0  }
  0x17 LB: > { %4576 = sst [smem:[#allocation18_spill]] %s3861_s19  ;;  %s3985_s21 = sadd.s32 4294967295, %s3865_s20   ;;  %s3865_s20 = sphi %s3972_s20, %s4605_s20   ;;  %s3861_s19 = sphi %s3970_s19, %s4607_s19   ;;  %s3857_s0 = sphi %s3968_s0, %s4609_s0   ;;  %s3853_s18 = sphi %s3966_s18, %s4608_s18  }
  0x18   : > { %s3988_s22 = sadd.s32 1, %s3865_s20   ;;  %s117_s24 = sadd.s32 1, %s3861_s19 }
  0x19   : > { %4577 = sst [smem:[#allocation19_spill]] %s3988_s22  ;;  %s114_s23 = ssub.s32 %s3865_s20, %s3988_s22 }
  0x1a   : > { %p115_p5 = scmp.eq.s32.totalorder %s114_s23, 0  ;;  %p124_p6 = scmp.ne.s32.totalorder %s3861_s19, %s3857_s0 }
  0x1b   : > { %p125_p7 = scmp.eq.s32.totalorder %s3865_s20, 0  ;;  %p130_p8 = scmp.ne.s32.totalorder %s3857_s0, %s3853_s18 }
  0x1c   : > { %s3998_s25 = scalar_select %p115_p5, %s3861_s19, %s117_s24  }
  0x1d   : > { %p126_p9 = por %p125_p7, %p124_p6  ;;  %p131_p10 = scmp.eq.s32.totalorder %s3985_s21, 0 }
  0x1e   : > { %4578 = sst [smem:[#allocation20_spill]] %s3998_s25  ;;  %p3596_p11 = scmp.lt.s32.totalorder %s3865_s20, 2 }
  0x1f   : > { %p4002_p12 = por %p131_p10, %p130_p8  ;;  %s4556_s27 = sand.u32 1, %s3861_s19  }
  0x20   : > { %s4009_s28 = sshll.u32 %s4556_s27, 5  ;;  %s4012_s29 = sshll.u32 %s3865_s20, 9 }
  0x21   : > { %s4579_s26 = scalar_select %p4002_p12, 1, 0 }
  0x22   : > { %p4014_p13 = pnand %p3596_p11, %p126_p9  ;;  %s453_s15 = sand.u32 1, %s3865_s20  }
  0x23   : > { %s4581_s6 = sld [smem:[#allocation24_spill]]  ;;  %s457_s23 = scalar_lea.vmem [#allocation10], %s4009_s28 }
  0x24   : > { %s464_s24 = sshll.u32 %s457_s23, 4  ;;  %s4030_s27 = scalar_lea.sflag [#allocation11], %s453_s15  ;;  %s4027_s24 = int_to_ptr.vmem [resolvable:$true] %s464_s24 }
  0x25   : > { %p4036_p3 = pneg %p4014_p13 }
  0x29   : > { %s4023_s18 = scalar_lea.hbm %s4581_s6, %s4012_s29  ;;  %s3710_s23 = scalar_lea.hbm %s4581_s6, 1024 }
  0x2a   : > { %s3705_s25 = scalar_lea.hbm %s4023_s18, 512  ;;  %p3711_p6 = scmp.lt.u32.totalorder %s4023_s18, %s4581_s6 }
  0x2b   : > { %p3706_p2 = scmp.ne.s32.totalorder %s4023_s18, %s3705_s25  ;;  %p3712_p7 = scmp.lt.u32.totalorder %s3710_s23, %s3705_s25 }
  0x2c   : > { %p3714_p9 = scmp.lt.u32.totalorder %s3705_s25, %s4023_s18 }
  0x2d   : > { %p3708_p4 = pnand %p4036_p3, %p3706_p2  ;;  %p3713_p8 = por %p3712_p7, %p3711_p6 }
  0x2f   : > { %p3709_p5 = pneg %p3708_p4  ;;  %p3715_p10 = por %p3714_p9, %p3713_p8 }
  0x31   : > { %p3716_p11 = pnand %p3715_p10, %p3709_p5 }
  0x33   : > { %3719 = shalt.err (!%p3716_p11)
}
  0x34   : > { %s3720_s15 = scalar_lea.vmem %s4027_s24, 512  ;;  %s3868_s16 = smov [#allocation10]  }
  0x35   : > { %p3721_p2 = scmp.ne.s32.totalorder %s4027_s24, %s3720_s15  ;;  %s3725_s17 = sshll.u32 %s3868_s16, 4  ;;  %s3726_s17 = int_to_ptr.vmem [resolvable:$false] %s3725_s17 }
  0x36   : > { %s3727_s1 = scalar_lea.vmem %s3726_s17, 1024  ;;  %p3728_p1 = scmp.lt.s32.totalorder %s4027_s24, %s3726_s17 }
  0x37   : > { %p3723_p4 = pnand %p3721_p2, %p4036_p3  ;;  %p3729_p12 = scmp.lt.s32.totalorder %s3727_s1, %s3720_s15 }
  0x39   : > { %p3724_p0 = pneg %p3723_p4  ;;  %p3730_p6 = por %p3729_p12, %p3728_p1 }
  0x3b   : > { %p3731_p7 = pnand %p3730_p6, %p3724_p0 }
  0x3d   : > { %3734 = shalt.err (!%p3731_p7)
}
  0x3e   : > { %s4562_s14 = smov 128   ;;  %s4564_s25 = smov 8  }
  0x3f   : > { %3592 = dma.hbm_to_vmem [thread:$0]  (!%p4014_p13), %s4023_s18, 512, %s4027_s24, %s4030_s27, %s4562_s14, %s4562_s14, %s4564_s25  }
  0x40   : > { %p4583_p12 = scmp.lt.s32.totalorder %s3865_s20, 3  ;;  %p4584_p0 = scmp.ge.s32.totalorder %s3865_s20, 1 }
  0x41   : > { %s4586_s4 = sld [smem:[#allocation23_spill]]  ;;  %s430_s1 = scalar_lea.vmem [#allocation7], %s4009_s28 }
  0x42   : > { %p4067_p1 = pnand %p4584_p0, %p4583_p12  ;;  %s437_s6 = sshll.u32 %s430_s1, 4  ;;  %s4078_s6 = int_to_ptr.vmem [resolvable:$true] %s437_s6 }
  0x43   : > { %s4587_s8 = sld [smem:[#allocation25_spill]]  ;;  %s4588_s14 = sand.u32 1, %s3861_s19  }
  0x44   : > { %s4585_s23 = scalar_select %p4067_p1, 1, 0 }
  0x45   : > { %s4088_s25 = scalar_lea.sflag [#allocation8], %s4588_s14 }
  0x47   : > { %s4075_s17 = scalar_lea.hbm %s4586_s4, %s4012_s29  ;;  %s3740_s12 = scalar_lea.hbm %s4586_s4, 1024 }
  0x48   : > { %s3735_s13 = scalar_lea.hbm %s4075_s17, 512  ;;  %p3741_p10 = scmp.lt.u32.totalorder %s4075_s17, %s4586_s4 }
  0x49   : > { %s4084_s20 = scalar_lea.hbm %s4587_s8, %s4012_s29  ;;  %p3736_p5 = scmp.ne.s32.totalorder %s4075_s17, %s3735_s13 }
  0x4a   : > { %p3742_p11 = scmp.lt.u32.totalorder %s3740_s12, %s3735_s13  ;;  %p3744_p4 = scmp.lt.u32.totalorder %s3735_s13, %s4075_s17 }
  0x4b   : > { %p3738_p8 = pnand %p3736_p5, %p4036_p3 }
  0x4c   : > { %p3743_p2 = por %p3742_p11, %p3741_p10 }
  0x4d   : > { %p3739_p9 = pneg %p3738_p8 }
  0x4e   : > { %p3745_p6 = por %p3744_p4, %p3743_p2 }
  0x50   : > { %p3746_p7 = pnand %p3745_p6, %p3739_p9 }
  0x52   : > { %3749 = shalt.err (!%p3746_p7)
}
  0x53   : > { %s3750_s29 = scalar_lea.vmem %s4078_s6, 512  ;;  %s3871_s14 = smov [#allocation7]  }
  0x54   : > { %p3751_p12 = scmp.ne.s32.totalorder %s4078_s6, %s3750_s29  ;;  %s3755_s18 = sshll.u32 %s3871_s14, 4  ;;  %s3756_s18 = int_to_ptr.vmem [resolvable:$false] %s3755_s18 }
  0x55   : > { %s3757_s11 = scalar_lea.vmem %s3756_s18, 1024  ;;  %p3758_p8 = scmp.lt.s32.totalorder %s4078_s6, %s3756_s18 }
  0x56   : > { %p3753_p0 = pnand %p3751_p12, %p4036_p3  ;;  %p3759_p1 = scmp.lt.s32.totalorder %s3757_s11, %s3750_s29 }
  0x58   : > { %p3754_p5 = pneg %p3753_p0  ;;  %p3760_p10 = por %p3759_p1, %p3758_p8 }
  0x5a   : > { %p3761_p11 = pnand %p3760_p10, %p3754_p5 }
  0x5c   : > { %3764 = shalt.err (!%p3761_p11)
}
  0x5d   : > { %s4589_s12 = smov 8   ;;  %s4590_s13 = smov 128  }
  0x5e   : > { %3589 = dma.hbm_to_vmem [thread:$0]  (!%p4014_p13), %s4075_s17, 512, %s4078_s6, %s4088_s25, %s4590_s13, %s4590_s13, %s4589_s12  }
  0x5f   : > { %s484_s24 = scalar_lea.vmem [#allocation12], %s4009_s28  ;;  %s3765_s16 = scalar_lea.hbm %s4084_s20, 512 }
  0x60   : > { %s491_s15 = sshll.u32 %s484_s24, 4  ;;  %p3766_p1 = scmp.ne.s32.totalorder %s4084_s20, %s3765_s16  ;;  %s4116_s15 = int_to_ptr.vmem [resolvable:$true] %s491_s15 }
  0x61   : > { %s3770_s14 = scalar_lea.hbm %s4587_s8, 1024  ;;  %p3771_p4 = scmp.lt.u32.totalorder %s4084_s20, %s4587_s8 }
  0x62   : > { %p3768_p9 = pnand %p3766_p1, %p4036_p3  ;;  %p3772_p6 = scmp.lt.u32.totalorder %s3770_s14, %s3765_s16 }
  0x63   : > { %p3774_p12 = scmp.lt.u32.totalorder %s3765_s16, %s4084_s20 }
  0x64   : > { %p3769_p2 = pneg %p3768_p9  ;;  %p3773_p7 = por %p3772_p6, %p3771_p4 }
  0x66   : > { %p3775_p0 = por %p3774_p12, %p3773_p7 }
  0x68   : > { %p3776_p5 = pnand %p3775_p0, %p3769_p2 }
  0x6a   : > { %3779 = shalt.err (!%p3776_p5)
}
  0x6b   : > { %s3780_s6 = scalar_lea.vmem %s4116_s15, 512  ;;  %s3872_s28 = smov [#allocation12]  }
  0x6c   : > { %p3781_p8 = scmp.ne.s32.totalorder %s4116_s15, %s3780_s6  ;;  %s3785_s25 = sshll.u32 %s3872_s28, 4  ;;  %s3786_s25 = int_to_ptr.vmem [resolvable:$false] %s3785_s25 }
  0x6d   : > { %s3787_s17 = scalar_lea.vmem %s3786_s25, 1024  ;;  %p3788_p1 = scmp.lt.s32.totalorder %s4116_s15, %s3786_s25 }
  0x6e   : > { %p3783_p10 = pnand %p3781_p8, %p4036_p3  ;;  %p3789_p9 = scmp.lt.s32.totalorder %s3787_s17, %s3780_s6 }
  0x70   : > { %p3784_p11 = pneg %p3783_p10  ;;  %p3790_p4 = por %p3789_p9, %p3788_p1 }
  0x72   : > { %p3791_p6 = pnand %p3790_p4, %p3784_p11 }
  0x74   : > { %3794 = shalt.err (!%p3791_p6)
}
  0x75   : > { %3595 = dma.hbm_to_vmem [thread:$0]  (!%p4014_p13), %s4084_s20, 512, %s4116_s15, %s4030_s27, %s4590_s13, %s4590_s13, %s4589_s12  }
  0x76   : > { %p4591_p3 = scmp.ne.s32.totalorder %s4585_s23, 0 }
  0x77   : > { %s535_s22 = sand.u32 (!%p4591_p3), 1, %s3857_s0   ;;  %p4592_p2 = scmp.ne.s32.totalorder (!%p4591_p3), %s4579_s26, 0 }
  0x78   : > { %533 = sbr.rel (%p4591_p3) target bundleno = 5690 (0x163a), region = 72  ;;  %s3261_s24 = sshll.u32 (!%p4591_p3), %s535_s22, 5 }
  0x79   : > { %s536_s16 = scalar_lea.sflag (!%p4591_p3), [#allocation8], %s535_s22  ;;  %s4146_s1 = scalar_lea.vmem (!%p4591_p3), [#allocation7], %s3261_s24 }
  0x7f   : > { %3840 = dma.done.wait (%p4592_p2), %s536_s16, 512  }
  0x80   : > { %3842 = vsyncadd (%p4592_p2), %s536_s16, 4294966784  ;;  %s544_s30 = sand.u32 1, %s3985_s21   ;;  %s4153_s27 = scalar_lea.vmem [#allocation10], %s3261_s24 }
  0x81   : > { %s545_s29 = scalar_lea.sflag [#allocation11], %s544_s30 }
  0x82   : > { %3844 = dma.done.wait (%p4592_p2), %s545_s29, 1024  }
  0x83   : > { %3846 = vsyncadd (%p4592_p2), %s545_s29, 4294966272  ;;  %p634_p13 = scmp.lt.s32.totalorder %s3985_s21, 1  ;;  %s4593_s2 = sld [smem:[#allocation22_spill]] }
  0x84   : > { %s4594_s15 = sld [smem:[#allocation26_spill]]  ;;  %s4595_s11 = sld [smem:[#allocation27_spill]] }
  0x85   : > { %s4161_s23 = scalar_select %p634_p13, %s3985_s21, 1 }
  0x86   : > { %s4596_s25 = sld [smem:[#allocation28_spill]]  ;;  %s4199_s22 = scalar_lea.vmem [#allocation12], %s3261_s24 }
  0x87   : > { %s3332_s20 = sshll.u32 %s4161_s23, 5  ;;  %s650_s29 = scalar_lea.vmem %s4550_s9, %s4161_s23 }
  0x88   : > { %s653_s12 = scalar_lea.vmem %s4551_s10, %s4161_s23  ;;  %p3266_p7 = scmp.ne.s32.totalorder %s3985_s21, 0 }
  0x89   : > { %s638_s18 = scalar_lea.vmem %s4593_s2, %s3332_s20  ;;  %s4597_s8 = sld [smem:[#allocation21_spill]] (!%p3266_p7)  ;;  %vm669_vm0 = vcmask (!%p3266_p7), 261120  }
  0x8a   : > { %s656_s20 = scalar_lea.vmem %s4594_s15, %s4161_s23  ;;  %s659_s6 = scalar_lea.vmem %s4595_s11, %s4161_s23 }
  0x8b   : > { %666 = sbr.rel (%p3266_p7) target bundleno = 146 (0x92), region = 88 }
  0x8c   : > { %s662_s17 = scalar_lea.vmem %s4596_s25, %s4161_s23 }
  0x8f   : > { %v667_v0 = vld [vmem:[%s4597_s8] sm:$0xff] (!%p3266_p7)  ;;  %v668_v1 = vld [vmem:[%s4597_s8 + $0x8] sm:$0xff] (!%p3266_p7) }
  0x90   : > { %670 = vst.msk [vmem:[#allocation2] sm:$0xff] (!%p3266_p7), %vm669_vm0, %v667_v0  ;;  %671 = vst.msk [vmem:[#allocation2 + $0x8] sm:$0xff] (!%p3266_p7), %vm669_vm0, %v668_v1 }
  0x92 PF: > { %v674_v2 = vld [vmem:[%s638_s18] sm:$0xff]  ;;  %v675_v3 = vld [vmem:[%s638_s18 + $0x8] sm:$0xff]  ;;  %v676_v4 = vld [vmem:[%s638_s18 + $0x10] sm:$0xff]  ;;  %vm685_vm1 = vcmask 261120   ;;  %v3873_v10 = vmov 0.0   ;;  %s4598_s24 = scalar_lea.vmem %s4544_s3, %s4161_s23  ;;  %vm767_vm2 = vcmask 785408   ;;  %v770_v20 = vlaneseq }
  0x93   : > { %v3552_v5 = vpack.c.bf16 %v675_v3, %v674_v2  ;;  %v677_v6 = vld [vmem:[%s638_s18 + $0x18] sm:$0xff]  ;;  %3410 = vmatprep.subr.mxu1 %v3873_v10  ;;  %v3267_v11 = vld [vmem:[%s4598_s24] ss:$0 sm:$0xff]  ;;  %vm3874_vm3 = vmmov 0   ;;  %s3875_s18 = smov 120   ;;  %s3876_s28 = smov 96  }
  0x94   : > { %v3556_v8 = vpack.c.bf16 %v677_v6, %v676_v4  ;;  %3412 = vmatprep.mubr.msk.f32.mxu1 %vm3874_vm3, %v3873_v10  ;;  %s3877_s13 = smov 88   ;;  %vm780_vm4 = vcmask 64512   ;;  %s772_s15 = sld [smem:[#allocation6]]  ;;  %v4247_v21 = vand.u32 127, %v770_v20  ;;  %v4268_v44 = vld [vmem:[%s4146_s1 + $0x8] sm:$0xff]  ;;  %v4281_v53 = vld [vmem:[%s4146_s1] sm:$0xff] }
  0x95   : > { %3553 = vmatprep.subr.bf16.mxu0 %v3552_v5  ;;  %s3878_s14 = smov 56   ;;  %s3879_s11 = smov 64  }
  0x96   : > { %3555 = vmatpush3.bf16.msra.mxu0 %v3552_v5  ;;  %s3880_s25 = smov 80   ;;  %s3881_s16 = smov 112  }
  0x97   : > { %v4208_v7 = vld [vmem:[#allocation2] sm:$0xff]  ;;  %3557 = vmatprep.subr.bf16.mxu0 %v3556_v8  ;;  %v4212_v9 = vld [vmem:[#allocation2 + $0x8] sm:$0xff]  ;;  %s3882_s4 = smov 72   ;;  %s3883_s26 = smov 104  }
  0x98   : > { %3407 = vmatprep.mubr.msk.f32.mxu0 %vm685_vm1, %v4208_v7  ;;  %s3884_s30 = smov 48   ;;  %s3885_s2 = smov 40  }
  0x99   : > { %s3290_s19 = sld [smem:[#allocation6 + $0x1]]  ;;  %p3321_p12 = scmp.ne.s32.totalorder %s3985_s21, 1 }
  0x9a   : > { %3559 = vmatpush3.bf16.msra.mxu0 %v3556_v8  ;;  %v773_v22 = vstv %s772_s15  ;;  %vm3042_vm9 = vcmask (!%p3321_p12), 253952  }
  0x9b   : > { %3420 = vmatprep.subr.mxu0 %v3873_v10  ;;  %vm774_vm5 = vcmp.ge.s32.totalorder %v4247_v21, %v773_v22 }
  0x9c   : > { %v4251_v24 = vsel %vm774_vm5, -1e+30, %v3873_v10 }
  0x9d   : > { %3408 = vmatmul.mubr.msk.f32.vlgmr.msra.gmra.mrb[0].mxu0 %vm685_vm1, %v4212_v9 }
  0x9e   : > { %3422 = vmatprep.mubr.msk.f32.mxu0 %vm3874_vm3, %v3873_v10 }
 0x170   : > { %v3409_v12 = vpop.f32.mrb[0].mxu0 }
 0x171   : > { %v764_v13 = vadd.f32 %v3409_v12, %v3267_v11  ;;  %v758_v14 = vpop.f32.mrb[1].mxu0 }
 0x172   : > { %v759_v15 = vadd.f32 %v3267_v11, %v758_v14 }
 0x173   : > { %769 = vst.msk [vmem:[#allocation3 + $0x8] sm:$0xff] %vm767_vm2, %v764_v13 }
 0x174   : > { %768 = vst.msk [vmem:[#allocation3] sm:$0xff] %vm767_vm2, %v759_v15 }
 0x17a   : > { %v4304_v6 = vld [vmem:[#allocation3 + $0x8] sm:$0xff] }
 0x17b   : > { %v4227_v16 = vld [vmem:[#allocation3] sm:$0xff] }
 0x17c   : > { %945 = vrot.lane.b32.xlu1 %v4227_v16, %s3875_s18  ;;  %778 = vrot.lane.b32.xlu0 %v4227_v16, %s3876_s28 }
 0x180   : > { %947 = vrot.lane.b32.xlu0 %v4227_v16, %s3877_s13 }
 0x1ee   : > { %v779_v17 = vpop.permute.xlu0 %778  ;;  %v946_v19 = vpop.permute.xlu1 %945 }
 0x1ef   : > { %3411 = vmatpush3.xpose.msk.msra.mxu1 %vm780_vm4, %v779_v17 }
 0x1f0   : > { %3415 = vmatprep.subr.mxu1 %v3873_v10 }
 0x1f2   : > { %3413 = vmatmul.mubr.msk.f32.vlgmr.msra.gmra.mrb[0].mxu1 %vm780_vm4, %v4227_v16  ;;  %v948_v18 = vpop.permute.xlu0 %947 }
 0x1f3   : > { %3421 = vmatpush3.xpose.msk.msra.mxu0 %vm780_vm4, %v948_v18  ;;  %3417 = vmatprep.mubr.msk.f32.mxu1 %vm3874_vm3, %v3873_v10 }
 0x1f4   : > { %3430 = vmatprep.subr.mxu0 %v3873_v10 }
 0x1f6   : > { %3423 = vmatmul.mubr.msk.f32.vlgmr.msra.gmra.mrb[2].mxu0 %vm780_vm4, %v946_v19 }
 0x1f7   : > { %3432 = vmatprep.mubr.msk.f32.mxu0 %vm3874_vm3, %v3873_v10  ;;  %3431 = vmatpush3.msra.mxu0 %v4268_v44 }
 0x1f8   : > { %3440 = vmatprep.subr.mxu0 %v3873_v10 }
 0x2c5   : > { %v851_v23 = vpop.f32.mrb[0].mxu1 }
 0x2c6   : > { %v855_v25 = vmul.f32 0.35355338, %v851_v23  ;;  %v3414_v26 = vpop.f32.mrb[1].mxu1 }
 0x2c8   : > { %v856_v27 = vadd.f32 %v855_v25, %v4251_v24  ;;  %v4321_v25 = vld [vmem:[%s4146_s1 + $0x10] sm:$0xff] }
 0x2c9   : > { %v1019_v28 = vpop.f32.mrb[2].mxu0 }
 0x2ca   : > { %v1023_v29 = vmul.f32 0.35355338, %v1019_v28  ;;  %v3424_v30 = vpop.f32.mrb[3].mxu0  ;;  %v857_v31 = vsel %vm780_vm4, %v856_v27, -inf }
 0x2cb   : > { %858 = vmax.xlane.f32.xlu1 %v857_v31 }
 0x2cc   : > { %v1024_v32 = vadd.f32 %v1023_v29, %v4251_v24 }
 0x2ce   : > { %v1025_v33 = vsel %vm780_vm4, %v1024_v32, -inf }
 0x2cf   : > { %1026 = vmax.xlane.f32.xlu0 %v1025_v33 }
 0x358   : > { %v859_v34 = vpop.xlane.xlu1 %858 }
 0x359   : > { %v860_v35 = vsub.f32 %v856_v27, %v859_v34 }
 0x35b   : > { %v861_v36 = vmul.f32 1.442695, %v860_v35 }
 0x35c   : > { %v1027_v37 = vpop.xlane.xlu0 %1026 }
 0x35d   : > { %3649 = vpow2.f32 %v861_v36  ;;  %v1028_v38 = vsub.f32 %v1024_v32, %v1027_v37 }
 0x35f   : > { %v1029_v39 = vmul.f32 1.442695, %v1028_v38 }
 0x361   : > { %3651 = vpow2.f32 %v1029_v39 }
 0x367   : > { %v3650_v40 = vpop.eup %3649 }
 0x368   : > { %v863_v41 = vsel %vm780_vm4, %v3650_v40, 0.0 }
 0x369   : > { %864 = vadd.xlane.f32.xlu0 %v863_v41 }
 0x36b   : > { %v3652_v42 = vpop.eup %3651 }
 0x36c   : > { %v1031_v43 = vsel %vm780_vm4, %v3652_v42, 0.0 }
 0x36d   : > { %1032 = vadd.xlane.f32.xlu1 %v1031_v43 }
 0x37e   : > { %1036 = vrot.lane.b32.xlu1 %v4227_v16, %s3878_s14 }
 0x37f   : > { %868 = vrot.lane.b32.xlu0 %v4227_v16, %s3879_s11 }
 0x382   : > { %1262 = vrot.lane.b32.xlu1 %v4227_v16, %s3880_s25 }
 0x383   : > { %1260 = vrot.lane.b32.xlu0 %v4227_v16, %s3881_s16 }
 0x3f6   : > { %v865_v45 = vpop.xlane.xlu0 %864 }
 0x3f7   : > { %3653 = vrcp.f32 %v865_v45 }
 0x3fa   : > { %v1033_v46 = vpop.xlane.xlu1 %1032  ;;  %v869_v47 = vpop.permute.xlu0 %868 }
 0x3fb   : > { %3655 = vrcp.f32 %v1033_v46  ;;  %3416 = vmatpush3.msra.mxu1 %v869_v47  ;;  %v4358_v47 = vld [vmem:[%s4146_s1 + $0x18] sm:$0xff] }
 0x3fc   : > { %3425 = vmatprep.subr.mxu1 %v3873_v10 }
 0x3fe   : > { %v1037_v50 = vpop.permute.xlu1 %1036  ;;  %v1261_v59 = vpop.permute.xlu0 %1260 }
 0x401   : > { %v3654_v48 = vpop.eup %3653 }
 0x402   : > { %v867_v49 = vmul.f32 %v3654_v48, %v3650_v40  ;;  %v1263_v57 = vpop.permute.xlu1 %1262  ;;  %v1756_v48 = vstv %s3290_s19  ;;  %s3323_s19 = sld [smem:[#allocation6 + $0x1]] (!%p3321_p12) }
 0x403   : > { %vm1757_vm6 = vcmp.ge.s32.totalorder %v4247_v21, %v1756_v48 }
 0x404   : > { %3418 = vmatmul.mubr.msk.f32.vlgmr.msra.gmra.mrb[2].mxu1 %vm780_vm4, %v867_v49 }
 0x405   : > { %v3656_v51 = vpop.eup %3655  ;;  %3426 = vmatpush3.msra.mxu1 %v1037_v50  ;;  %3427 = vmatprep.mubr.msk.f32.mxu1 %vm3874_vm3, %v3873_v10 }
 0x406   : > { %v1035_v52 = vmul.f32 %v3656_v51, %v3652_v42  ;;  %3435 = vmatprep.subr.mxu1 %v3873_v10  ;;  %v4367_v51 = vsel %vm1757_vm6, -1e+30, %v3873_v10 }
 0x408   : > { %3428 = vmatmul.mubr.msk.f32.vlgmr.msra.gmra.mrb[4].mxu1 %vm780_vm4, %v1035_v52  ;;  %s3058_s1 = sadd.s32 (!%p3321_p12), 1, %s3323_s19 }
 0x409   : > { %3437 = vmatprep.mubr.msk.f32.mxu1 %vm3874_vm3, %v3873_v10  ;;  %3436 = vmatpush3.msra.mxu1 %v4281_v53  ;;  %s3059_s24 = scvt.s32.f32 (!%p3321_p12), %s3058_s1 }
 0x40a   : > { %3445 = vmatprep.subr.mxu1 %v3873_v10 }
 0x4d7   : > { %v940_v54 = vpop.f32.mrb[2].mxu1 }
 0x4d8   : > { %v3419_v55 = vpop.f32.mrb[3].mxu1  ;;  %3438 = vmatmul.mubr.msk.f32.vlgmr.msra.gmra.mrb[6].mxu1 %vm780_vm4, %v940_v54 }
 0x4d9   : > { %3447 = vmatprep.mubr.msk.f32.mxu1 %vm3874_vm3, %v3873_v10 }
 0x4db   : > { %v1108_v56 = vpop.f32.mrb[4].mxu1 }
 0x4dc   : > { %v3429_v58 = vpop.f32.mrb[5].mxu1  ;;  %3433 = vmatmul.mubr.msk.f32.vlgmr.msra.gmra.mrb[4].mxu0 %vm780_vm4, %v1108_v56 }
 0x4dd   : > { %3441 = vmatpush3.xpose.msk.msra.mxu0 %vm780_vm4, %v1263_v57  ;;  %3442 = vmatprep.mubr.msk.f32.mxu0 %vm3874_vm3, %v3873_v10 }
 0x4de   : > { %3450 = vmatprep.subr.mxu0 %v3873_v10 }
 0x4e0   : > { %3443 = vmatmul.mubr.msk.f32.vlgmr.msra.gmra.mrb[6].mxu0 %vm780_vm4, %v1261_v59 }
 0x4e1   : > { %3452 = vmatprep.mubr.msk.f32.mxu0 %vm3874_vm3, %v3873_v10  ;;  %3451 = vmatpush3.msra.mxu0 %v4321_v25 }
 0x4e2   : > { %3460 = vmatprep.subr.mxu0 %v3873_v10 }
 0x5ab   : > { %v1256_v60 = vpop.f32.mrb[6].mxu1 }
 0x5ac   : > { %v3439_v61 = vpop.f32.mrb[7].mxu1 }
 0x5af   : > { %v1183_v62 = vpop.f32.mrb[4].mxu0 }
 0x5b0   : > { %v4296_v63 = vadd.f32 %v1256_v60, %v1183_v62  ;;  %v3434_v0 = vpop.f32.mrb[5].mxu0 }
 0x5b3   : > { %v1334_v1 = vpop.f32.mrb[6].mxu0 }
 0x5b4   : > { %v1338_v2 = vmul.f32 0.35355338, %v1334_v1  ;;  %v3444_v3 = vpop.f32.mrb[7].mxu0 }
 0x5b6   : > { %v1339_v4 = vadd.f32 %v1338_v2, %v4251_v24 }
 0x5b8   : > { %v1340_v5 = vsel %vm780_vm4, %v1339_v4, -inf }
 0x5b9   : > { %1341 = vmax.xlane.f32.xlu1 %v1340_v5 }
 0x5ca   : > { %1505 = vrot.lane.b32.xlu1 %v4227_v16, %s3882_s4 }
 0x5ce   : > { %1503 = vrot.lane.b32.xlu1 %v4227_v16, %s3883_s26 }
 0x5d2   : > { %1761 = vrot.lane.b32.xlu1 %v4304_v6, %s3876_s28 }
 0x646   : > { %v1342_v8 = vpop.xlane.xlu1 %1341 }
 0x647   : > { %v1343_v11 = vsub.f32 %v1339_v4, %v1342_v8 }
 0x649   : > { %v1344_v12 = vmul.f32 1.442695, %v1343_v11 }
 0x64a   : > { %v1506_v19 = vpop.permute.xlu1 %1505 }
 0x64b   : > { %3657 = vpow2.f32 %v1344_v12 }
 0x64e   : > { %v1504_v23 = vpop.permute.xlu1 %1503 }
 0x652   : > { %v1762_v40 = vpop.permute.xlu1 %1761 }
 0x655   : > { %v3658_v13 = vpop.eup %3657 }
 0x656   : > { %v1346_v14 = vsel %vm780_vm4, %v3658_v13, 0.0 }
 0x657   : > { %1347 = vadd.xlane.f32.xlu0 %v1346_v14 }
 0x66d   : > { %1351 = vrot.lane.b32.xlu0 %v4227_v16, %s3884_s30 }
 0x6e4   : > { %v1348_v15 = vpop.xlane.xlu0 %1347 }
 0x6e5   : > { %3659 = vrcp.f32 %v1348_v15 }
 0x6e8   : > { %v1352_v17 = vpop.permute.xlu0 %1351 }
 0x6e9   : > { %3446 = vmatpush3.msra.mxu1 %v1352_v17 }
 0x6ea   : > { %3455 = vmatprep.subr.mxu1 %v3873_v10 }
 0x6ef   : > { %v3660_v18 = vpop.eup %3659 }
 0x6f0   : > { %v1350_v22 = vmul.f32 %v3660_v18, %v3658_v13 }
 0x6f2   : > { %3448 = vmatmul.mubr.msk.f32.vlgmr.msra.gmra.mrb[8].mxu1 %vm780_vm4, %v1350_v22 }
 0x6f3   : > { %3456 = vmatpush3.xpose.msk.msra.mxu1 %vm780_vm4, %v1506_v19  ;;  %3457 = vmatprep.mubr.msk.f32.mxu1 %vm3874_vm3, %v3873_v10 }
 0x6f4   : > { %3465 = vmatprep.subr.mxu1 %v3873_v10 }
 0x6f6   : > { %3458 = vmatmul.mubr.msk.f32.vlgmr.msra.gmra.mrb[10].mxu1 %vm780_vm4, %v1504_v23 }
 0x6f7   : > { %3467 = vmatprep.mubr.msk.f32.mxu1 %vm3874_vm3, %v3873_v10  ;;  %3466 = vmatpush3.msra.mxu1 %v4358_v47 }
 0x6f8   : > { %3475 = vmatprep.subr.mxu1 %v3873_v10 }
 0x7c5   : > { %v1423_v26 = vpop.f32.mrb[8].mxu1 }
 0x7c6   : > { %v3449_v27 = vpop.f32.mrb[9].mxu1  ;;  %3453 = vmatmul.mubr.msk.f32.vlgmr.msra.gmra.mrb[8].mxu0 %vm780_vm4, %v1423_v26 }
 0x7c7   : > { %3462 = vmatprep.mubr.msk.f32.mxu0 %vm3874_vm3, %v3873_v10 }
 0x7c9   : > { %v1577_v28 = vpop.f32.mrb[10].mxu1 }
 0x7ca   : > { %v1581_v29 = vmul.f32 0.35355338, %v1577_v28  ;;  %v3459_v30 = vpop.f32.mrb[11].mxu1 }
 0x7cc   : > { %v1582_v31 = vadd.f32 %v1581_v29, %v4251_v24 }
 0x7ce   : > { %v1583_v32 = vsel %vm780_vm4, %v1582_v31, -inf }
 0x7cf   : > { %1584 = vmax.xlane.f32.xlu0 %v1583_v32 }
 0x7e5   : > { %1594 = vrot.lane.b32.xlu0 %v4227_v16, %s3885_s2 }
 0x7e9   : > { %1929 = vrot.lane.b32.xlu0 %v4304_v6, %s3877_s13 }
 0x85c   : > { %v1585_v33 = vpop.xlane.xlu0 %1584 }
 0x85d   : > { %v1586_v34 = vsub.f32 %v1582_v31, %v1585_v33 }
 0x85f   : > { %v1587_v35 = vmul.f32 1.442695, %v1586_v34 }
 0x860   : > { %v1595_v36 = vpop.permute.xlu0 %1594 }
 0x861   : > { %3661 = vpow2.f32 %v1587_v35  ;;  %3461 = vmatpush3.msra.mxu0 %v1595_v36 }
 0x862   : > { %3470 = vmatprep.subr.mxu0 %v3873_v10 }
 0x864   : > { %v1930_v45 = vpop.permute.xlu0 %1929 }
 0x86b   : > { %v3662_v37 = vpop.eup %3661 }
 0x86c   : > { %v1589_v24 = vsel %vm780_vm4, %v3662_v37, 0.0 }
 0x86d   : > { %1590 = vadd.xlane.f32.xlu1 %v1589_v24 }
 0x87e   : > { %1927 = vrot.lane.b32.xlu1 %v4304_v6, %s3875_s18  ;;  %s4599_s18 = scalar_lea.vmem %s4546_s5, %s4161_s23 }
 0x87f   : > { %v4389_v13 = vld [vmem:[%s4599_s18] ss:$0 sm:$0xff] }
 0x899   : > { %v1498_v38 = vpop.f32.mrb[8].mxu0 }
 0x89a   : > { %v4339_v16 = vadd.f32 %v1498_v38, %v4296_v63  ;;  %v3454_v39 = vpop.f32.mrb[9].mxu0 }
 0x8fa   : > { %v1591_v41 = vpop.xlane.xlu1 %1590 }
 0x8fb   : > { %3663 = vrcp.f32 %v1591_v41 }
 0x8fe   : > { %v1928_v46 = vpop.permute.xlu1 %1927 }
 0x905   : > { %v3664_v42 = vpop.eup %3663 }
 0x906   : > { %v1593_v43 = vmul.f32 %v3664_v42, %v3662_v37 }
 0x908   : > { %3463 = vmatmul.mubr.msk.f32.vlgmr.msra.gmra.mrb[10].mxu0 %vm780_vm4, %v1593_v43 }
 0x909   : > { %3471 = vmatpush3.xpose.msk.msra.mxu0 %vm780_vm4, %v1762_v40  ;;  %3472 = vmatprep.mubr.msk.f32.mxu0 %vm3874_vm3, %v3873_v10 }
 0x90a   : > { %3480 = vmatprep.subr.mxu0 %v3873_v10 }
 0x90c   : > { %3473 = vmatmul.mubr.msk.f32.vlgmr.msra.gmra.mrb[12].mxu0 %vm780_vm4, %v4304_v6 }
 0x90d   : > { %3481 = vmatpush3.xpose.msk.msra.mxu0 %vm780_vm4, %v1930_v45  ;;  %3482 = vmatprep.mubr.msk.f32.mxu0 %vm3874_vm3, %v3873_v10 }
 0x90e   : > { %3490 = vmatprep.subr.mxu0 %v3873_v10 }
 0x910   : > { %3483 = vmatmul.mubr.msk.f32.vlgmr.msra.gmra.mrb[14].mxu0 %vm780_vm4, %v1928_v46 }
 0x911   : > { %3491 = vmatpush3.msra.mxu0 %v4268_v44  ;;  %3492 = vmatprep.mubr.msk.f32.mxu0 %vm3874_vm3, %v3873_v10 }
 0x912   : > { %3500 = vmatprep.subr.mxu0 %v3873_v10 }
 0x9db   : > { %v1666_v49 = vpop.f32.mrb[10].mxu0 }
 0x9dc   : > { %v3464_v50 = vpop.f32.mrb[11].mxu0  ;;  %3468 = vmatmul.mubr.msk.f32.vlgmr.msra.gmra.mrb[12].mxu1 %vm780_vm4, %v1666_v49 }
 0x9dd   : > { %3477 = vmatprep.mubr.msk.f32.mxu1 %vm3874_vm3, %v3873_v10 }
 0x9df   : > { %v1833_v44 = vpop.f32.mrb[12].mxu0 }
 0x9e0   : > { %v1837_v52 = vmul.f32 0.35355338, %v1833_v44  ;;  %v3474_v54 = vpop.f32.mrb[13].mxu0 }
 0x9e2   : > { %v1838_v55 = vadd.f32 %v1837_v52, %v4367_v51 }
 0x9e3   : > { %v2001_v56 = vpop.f32.mrb[14].mxu0 }
 0x9e4   : > { %v2005_v57 = vmul.f32 0.35355338, %v2001_v56  ;;  %v3484_v58 = vpop.f32.mrb[15].mxu0  ;;  %v1839_v59 = vsel %vm780_vm4, %v1838_v55, -inf }
 0x9e5   : > { %1840 = vmax.xlane.f32.xlu0 %v1839_v59 }
 0x9e6   : > { %v2006_v60 = vadd.f32 %v2005_v57, %v4367_v51 }
 0x9e8   : > { %v2007_v21 = vsel %vm780_vm4, %v2006_v60, -inf }
 0x9e9   : > { %2008 = vmax.xlane.f32.xlu1 %v2007_v21 }
 0x9fa   : > { %1850 = vrot.lane.b32.xlu1 %v4304_v6, %s3879_s11 }
 0x9fe   : > { %2243 = vrot.lane.b32.xlu1 %v4304_v6, %s3880_s25 }
 0xa02   : > { %2241 = vrot.lane.b32.xlu1 %v4304_v6, %s3881_s16 }
 0xa72   : > { %v1841_v61 = vpop.xlane.xlu0 %1840 }
 0xa73   : > { %v1842_v62 = vsub.f32 %v1838_v55, %v1841_v61 }
 0xa75   : > { %v1843_v63 = vmul.f32 1.442695, %v1842_v62 }
 0xa76   : > { %v2009_v0 = vpop.xlane.xlu1 %2008 }
 0xa77   : > { %3665 = vpow2.f32 %v1843_v63  ;;  %v2010_v1 = vsub.f32 %v2006_v60, %v2009_v0 }
 0xa79   : > { %v2011_v2 = vmul.f32 1.442695, %v2010_v1 }
 0xa7a   : > { %v1851_v3 = vpop.permute.xlu1 %1850 }
 0xa7b   : > { %3667 = vpow2.f32 %v2011_v2  ;;  %3476 = vmatpush3.msra.mxu1 %v1851_v3 }
 0xa7c   : > { %3485 = vmatprep.subr.mxu1 %v3873_v10 }
 0xa7e   : > { %v2244_v31 = vpop.permute.xlu1 %2243 }
 0xa81   : > { %v3666_v4 = vpop.eup %3665 }
 0xa82   : > { %v1845_v5 = vsel %vm780_vm4, %v3666_v4, 0.0 }
 0xa83   : > { %1846 = vadd.xlane.f32.xlu0 %v1845_v5 }
 0xa85   : > { %v3668_v8 = vpop.eup %3667 }
 0xa86   : > { %v2013_v11 = vsel %vm780_vm4, %v3668_v8, 0.0 }
 0xa87   : > { %2014 = vadd.xlane.f32.xlu0 %v2013_v11 }
 0xa9d   : > { %2018 = vrot.lane.b32.xlu0 %v4304_v6, %s3878_s14 }
 0xaaf   : > { %v1741_v12 = vpop.f32.mrb[12].mxu1 }
 0xab0   : > { %v1745_v14 = vadd.f32 %v1741_v12, %v4339_v16  ;;  %v3469_v15 = vpop.f32.mrb[13].mxu1 }
 0xab2   : > { %v1753_v17 = vadd.f32 %v4389_v13, %v1745_v14 }
 0xab4   : > { %1754 = vst.msk [vmem:[#allocation4] sm:$0xff] %vm685_vm1, %v1753_v17 }
 0xabb   : > { %v2734_v60 = vld [vmem:[#allocation4] sm:$0xff] }
 0xb10   : > { %v1847_v18 = vpop.xlane.xlu0 %1846 }
 0xb11   : > { %3669 = vrcp.f32 %v1847_v18 }
 0xb14   : > { %v2015_v19 = vpop.xlane.xlu0 %2014 }
 0xb15   : > { %3671 = vrcp.f32 %v2015_v19 }
 0xb18   : > { %v2019_v26 = vpop.permute.xlu0 %2018 }
 0xb1b   : > { %v3670_v22 = vpop.eup %3669 }
 0xb1c   : > { %v1849_v23 = vmul.f32 %v3670_v22, %v3666_v4 }
 0xb1e   : > { %3478 = vmatmul.mubr.msk.f32.vlgmr.msra.gmra.mrb[14].mxu1 %vm780_vm4, %v1849_v23 }
 0xb1f   : > { %v3672_v27 = vpop.eup %3671  ;;  %3486 = vmatpush3.msra.mxu1 %v2019_v26  ;;  %3487 = vmatprep.mubr.msk.f32.mxu1 %vm3874_vm3, %v3873_v10 }
 0xb20   : > { %v2017_v28 = vmul.f32 %v3672_v27, %v3668_v8  ;;  %3495 = vmatprep.subr.mxu1 %v3873_v10 }
 0xb22   : > { %3488 = vmatmul.mubr.msk.f32.vlgmr.msra.gmra.mrb[16].mxu1 %vm780_vm4, %v2017_v28 }
 0xb23   : > { %3496 = vmatpush3.msra.mxu1 %v4281_v53  ;;  %3497 = vmatprep.mubr.msk.f32.mxu1 %vm3874_vm3, %v3873_v10  ;;  %v2242_v53 = vpop.permute.xlu1 %2241 }
 0xb24   : > { %3505 = vmatprep.subr.mxu1 %v3873_v10 }
 0xbf1   : > { %v1922_v29 = vpop.f32.mrb[14].mxu1 }
 0xbf2   : > { %v3479_v30 = vpop.f32.mrb[15].mxu1  ;;  %3498 = vmatmul.mubr.msk.f32.vlgmr.msra.gmra.mrb[18].mxu1 %vm780_vm4, %v1922_v29 }
 0xbf3   : > { %3507 = vmatprep.mubr.msk.f32.mxu1 %vm3874_vm3, %v3873_v10 }
 0xbf5   : > { %v2090_v32 = vpop.f32.mrb[16].mxu1 }
 0xbf6   : > { %v3489_v33 = vpop.f32.mrb[17].mxu1  ;;  %3493 = vmatmul.mubr.msk.f32.vlgmr.msra.gmra.mrb[16].mxu0 %vm780_vm4, %v2090_v32 }
 0xbf7   : > { %3501 = vmatpush3.xpose.msk.msra.mxu0 %vm780_vm4, %v2244_v31  ;;  %3502 = vmatprep.mubr.msk.f32.mxu0 %vm3874_vm3, %v3873_v10 }
 0xbf8   : > { %3510 = vmatprep.subr.mxu0 %v3873_v10 }
 0xbfa   : > { %3503 = vmatmul.mubr.msk.f32.vlgmr.msra.gmra.mrb[18].mxu0 %vm780_vm4, %v2242_v53 }
 0xbfb   : > { %3511 = vmatpush3.msra.mxu0 %v4321_v25  ;;  %3512 = vmatprep.mubr.msk.f32.mxu0 %vm3874_vm3, %v3873_v10 }
 0xbfc   : > { %3520 = vmatprep.subr.mxu0 %v3873_v10 }
 0xcc5   : > { %v2237_v34 = vpop.f32.mrb[18].mxu1 }
 0xcc6   : > { %v3499_v35 = vpop.f32.mrb[19].mxu1 }
 0xcc9   : > { %v2164_v36 = vpop.f32.mrb[16].mxu0 }
 0xcca   : > { %v2238_v37 = vadd.f32 %v2237_v34, %v2164_v36  ;;  %v3494_v24 = vpop.f32.mrb[17].mxu0 }
 0xccd   : > { %v2315_v38 = vpop.f32.mrb[18].mxu0 }
 0xcce   : > { %v2319_v16 = vmul.f32 0.35355338, %v2315_v38  ;;  %v3504_v39 = vpop.f32.mrb[19].mxu0  ;;  %v3312_v38 = vld [vmem:[%s656_s20] ss:$0 sm:$0xff]  ;;  %s4601_s20 = scalar_lea.vmem %s4548_s7, %s4161_s23 }
 0xcd0   : > { %v2320_v40 = vadd.f32 %v2319_v16, %v4367_v51 }
 0xcd2   : > { %v2321_v41 = vsel %vm780_vm4, %v2320_v40, -inf }
 0xcd3   : > { %2322 = vmax.xlane.f32.xlu0 %v2321_v41  ;;  %v2784_v41 = vld [vmem:[%s4153_s27 + $0x8] sm:$0xff] }
 0xce9   : > { %2332 = vrot.lane.b32.xlu0 %v4304_v6, %s3884_s30 }
 0xced   : > { %2483 = vrot.lane.b32.xlu0 %v4304_v6, %s3883_s26 }
 0xd60   : > { %v2323_v25 = vpop.xlane.xlu0 %2322 }
 0xd61   : > { %v2324_v42 = vsub.f32 %v2320_v40, %v2323_v25  ;;  %v2783_v40 = vld [vmem:[%s4153_s27] sm:$0xff] }
 0xd62   : > { %v3560_v25 = vpack.c.bf16 %v2784_v41, %v2783_v40  ;;  %v3045_v41 = vstv (!%p3321_p12), %s3323_s19 }
 0xd63   : > { %v2325_v43 = vmul.f32 1.442695, %v2324_v42  ;;  %v2785_v42 = vld [vmem:[%s4153_s27 + $0x10] sm:$0xff] }
 0xd64   : > { %v2333_v45 = vpop.permute.xlu0 %2332 }
 0xd65   : > { %3673 = vpow2.f32 %v2325_v43  ;;  %3506 = vmatpush3.msra.mxu1 %v2333_v45  ;;  %v2786_v43 = vld [vmem:[%s4153_s27 + $0x18] sm:$0xff] }
 0xd66   : > { %3515 = vmatprep.subr.mxu1 %v3873_v10  ;;  %v3564_v45 = vpack.c.bf16 %v2786_v43, %v2785_v42  ;;  %v3886_v42 = vmov (!%p3321_p12), 0.0  }
 0xd68   : > { %v2484_v54 = vpop.permute.xlu0 %2483 }
 0xd6f   : > { %v3674_v46 = vpop.eup %3673 }
 0xd70   : > { %v2327_v48 = vsel %vm780_vm4, %v3674_v46, 0.0 }
 0xd71   : > { %2328 = vadd.xlane.f32.xlu1 %v2327_v48  ;;  %v2878_v48 = vld [vmem:[%s4199_s22 + $0x8] sm:$0xff] }
 0xd82   : > { %2485 = vrot.lane.b32.xlu1 %v4304_v6, %s3882_s4 }
 0xdfe   : > { %v2329_v49 = vpop.xlane.xlu1 %2328 }
 0xdff   : > { %3675 = vrcp.f32 %v2329_v49 }
 0xe02   : > { %v2486_v52 = vpop.permute.xlu1 %2485 }
 0xe09   : > { %v3676_v50 = vpop.eup %3675 }
 0xe0a   : > { %v2331_v44 = vmul.f32 %v3676_v50, %v3674_v46  ;;  %v2877_v46 = vld [vmem:[%s4199_s22] sm:$0xff] }
 0xe0b   : > { %v3568_v49 = vpack.c.bf16 %v2878_v48, %v2877_v46 }
 0xe0c   : > { %3508 = vmatmul.mubr.msk.f32.vlgmr.msra.gmra.mrb[20].mxu1 %vm780_vm4, %v2331_v44 }
 0xe0d   : > { %3516 = vmatpush3.xpose.msk.msra.mxu1 %vm780_vm4, %v2486_v52  ;;  %3517 = vmatprep.mubr.msk.f32.mxu1 %vm3874_vm3, %v3873_v10 }
 0xe0e   : > { %3525 = vmatprep.subr.mxu1 %v3873_v10 }
 0xe10   : > { %3518 = vmatmul.mubr.msk.f32.vlgmr.msra.gmra.mrb[22].mxu1 %vm780_vm4, %v2484_v54 }
 0xe11   : > { %3526 = vmatpush3.msra.mxu1 %v4358_v47  ;;  %3527 = vmatprep.mubr.msk.f32.mxu1 %vm3874_vm3, %v3873_v10  ;;  %v2736_v47 = vadd.f32 %v2734_v60, %v4208_v7 }
 0xe12   : > { %3569 = vmatprep.subr.bf16.mxu1 %v3568_v49 }
 0xe13   : > { %v2740_v62 = vsel %vm685_vm1, %v2736_v47, 0.0 }
 0xedf   : > { %v2404_v55 = vpop.f32.mrb[20].mxu1 }
 0xee0   : > { %v3509_v56 = vpop.f32.mrb[21].mxu1  ;;  %3513 = vmatmul.mubr.msk.f32.vlgmr.msra.gmra.mrb[20].mxu0 %vm780_vm4, %v2404_v55 }
 0xee1   : > { %3522 = vmatprep.mubr.msk.f32.mxu0 %vm3874_vm3, %v3873_v10 }
 0xee3   : > { %v2557_v57 = vpop.f32.mrb[22].mxu1 }
 0xee4   : > { %v2561_v58 = vmul.f32 0.35355338, %v2557_v57  ;;  %v3519_v59 = vpop.f32.mrb[23].mxu1 }
 0xee5   : > { %v2880_v59 = vld [vmem:[%s4199_s22 + $0x18] sm:$0xff] }
 0xee6   : > { %v2562_v21 = vadd.f32 %v2561_v58, %v4367_v51  ;;  %v2879_v58 = vld [vmem:[%s4199_s22 + $0x10] sm:$0xff] }
 0xee7   : > { %v3572_v60 = vpack.c.bf16 %v2880_v59, %v2879_v58 }
 0xee8   : > { %v2563_v61 = vsel %vm780_vm4, %v2562_v21, -inf }
 0xee9   : > { %2564 = vmax.xlane.f32.xlu1 %v2563_v61 }
 0xeed   : > { %2741 = vadd.xlane.f32.xlu1 %v2740_v62 }
 0xf76   : > { %v2565_v63 = vpop.xlane.xlu1 %2564 }
 0xf77   : > { %v2566_v0 = vsub.f32 %v2562_v21, %v2565_v63  ;;  %v3313_v21 = vld [vmem:[%s4601_s20] ss:$0 sm:$0xff] }
 0xf79   : > { %v2567_v1 = vmul.f32 1.442695, %v2566_v0 }
 0xf7a   : > { %v2742_v19 = vpop.xlane.xlu1 %2741 }
 0xf7b   : > { %3677 = vpow2.f32 %v2567_v1  ;;  %v2747_v22 = vmul.f32 0.03125, %v2742_v19 }
 0xf7d   : > { %v2749_v23 = vsub.f32 %v2736_v47, %v2747_v22 }
 0xf7f   : > { %v2751_v29 = vmul.f32 %v2749_v23, %v2749_v23 }
 0xf81   : > { %v2753_v30 = vsel %vm685_vm1, %v2751_v29, 0.0 }
 0xf85   : > { %v3678_v2 = vpop.eup %3677 }
 0xf86   : > { %v2569_v10 = vsel %vm780_vm4, %v3678_v2, 0.0 }
 0xf87   : > { %2570 = vadd.xlane.f32.xlu0 %v2569_v10 }
 0xf9d   : > { %2574 = vrot.lane.b32.xlu0 %v4304_v6, %s3885_s2 }
 0xfb3   : > { %v2478_v51 = vpop.f32.mrb[20].mxu0 }
 0xfb4   : > { %v2482_v3 = vadd.f32 %v2478_v51, %v2238_v37  ;;  %v3514_v4 = vpop.f32.mrb[21].mxu0  ;;  %v3311_v37 = vld [vmem:[%s653_s12] ss:$0 sm:$0xff] }
0x1014   : > { %v2571_v5 = vpop.xlane.xlu0 %2570 }
0x1015   : > { %3679 = vrcp.f32 %v2571_v5 }
0x1018   : > { %v2575_v7 = vpop.permute.xlu0 %2574 }
0x1019   : > { %3521 = vmatpush3.msra.mxu0 %v2575_v7 }
0x101a   : > { %3561 = vmatprep.subr.bf16.mxu0 %v3560_v25 }
0x101f   : > { %v3680_v8 = vpop.eup %3679 }
0x1020   : > { %v2573_v11 = vmul.f32 %v3680_v8, %v3678_v2  ;;  %v3316_v2 = vld [vmem:[%s650_s29] ss:$0 sm:$0xff] }
0x1022   : > { %3523 = vmatmul.mubr.msk.f32.vlgmr.msra.gmra.mrb[22].mxu0 %vm780_vm4, %v2573_v11 }
0x1023   : > { %3563 = vmatpush3.bf16.msra.mxu0 %v3560_v25 }
0x1024   : > { %3565 = vmatprep.subr.bf16.mxu0 %v3564_v45 }
0x1027   : > { %3567 = vmatpush3.bf16.msra.mxu0 %v3564_v45 }
0x10f5   : > { %v2646_v12 = vpop.f32.mrb[22].mxu0 }
0x10f6   : > { %v3524_v14 = vpop.f32.mrb[23].mxu0  ;;  %3528 = vmatmul.mubr.msk.f32.vlgmr.msra.gmra.mrb[24].mxu1 %vm780_vm4, %v2646_v12 }
0x10f7   : > { %3571 = vmatpush3.bf16.msra.mxu1 %v3568_v49 }
0x10f8   : > { %3573 = vmatprep.subr.bf16.mxu1 %v3572_v60 }
0x10fb   : > { %3575 = vmatpush3.bf16.msra.mxu1 %v3572_v60 }
0x11c9   : > { %v2720_v15 = vpop.f32.mrb[24].mxu1 }
0x11ca   : > { %v2724_v17 = vadd.f32 %v2720_v15, %v2482_v3  ;;  %v3529_v18 = vpop.f32.mrb[25].mxu1 }
0x11cc   : > { %v2732_v6 = vadd.f32 %v4389_v13, %v2724_v17 }
0x11ce   : > { %2733 = vst.msk [vmem:[#allocation4 + $0x8] sm:$0xff] %vm685_vm1, %v2732_v6 }
0x11d5   : > { %v2735_v26 = vld [vmem:[#allocation4 + $0x8] sm:$0xff] }
0x11d6   : > { %v2737_v27 = vadd.f32 %v2735_v26, %v4212_v9 }
0x11d8   : > { %v2743_v28 = vsel %vm685_vm1, %v2737_v27, 0.0 }
0x11d9   : > { %2744 = vadd.xlane.f32.xlu1 %v2743_v28 }
0x11dd   : > { %2754 = vadd.xlane.f32.xlu1 %v2753_v30 }
0x1266   : > { %v2745_v31 = vpop.xlane.xlu1 %2744 }
0x1267   : > { %v2748_v32 = vmul.f32 0.03125, %v2745_v31 }
0x1269   : > { %v2750_v13 = vsub.f32 %v2737_v27, %v2748_v32 }
0x126a   : > { %v2755_v33 = vpop.xlane.xlu1 %2754 }
0x126b   : > { %v2759_v53 = vmul.f32 0.03125, %v2755_v33  ;;  %v2752_v34 = vmul.f32 %v2750_v13, %v2750_v13  ;;  %v3319_v33 = vld [vmem:[%s659_s6] ss:$0 sm:$0xff]  ;;  %s3023_s6 = sld [smem:[#allocation6]] (!%p3321_p12) }
0x126d   : > { %v2761_v35 = vadd.f32 1e-05, %v2759_v53  ;;  %v2756_v9 = vsel %vm685_vm1, %v2752_v34, 0.0  ;;  %v3320_v34 = vld [vmem:[%s662_s17] ss:$0 sm:$0xff] }
0x126e   : > { %2757 = vadd.xlane.f32.xlu1 %v2756_v9 }
0x126f   : > { %3681 = vrsqrt.f32 %v2761_v35 }
0x1271   : > { %s3037_s23 = sadd.s32 (!%p3321_p12), 1, %s3023_s6 }
0x1272   : > { %s3038_s17 = scvt.s32.f32 (!%p3321_p12), %s3037_s23 }
0x1274   : > { %v3039_v46 = vstv (!%p3321_p12), %s3038_s17 }
0x1279   : > { %v3682_v36 = vpop.eup %3681 }
0x127a   : > { %v2765_v24 = vmul.f32 %v3682_v36, %v2749_v23 }
0x127c   : > { %v2773_v16 = vmul.f32 %v3311_v37, %v2765_v24 }
0x127e   : > { %v2781_v39 = vadd.f32 %v3312_v38, %v2773_v16  ;;  %v3022_v16 = vshrl.u32 (!%p3321_p12), %v770_v20, 7 }
0x1280   : > { %3538 = vmatprep.mubr.msk.f32.mxu0 %vm685_vm1, %v2781_v39  ;;  %vm3046_vm8 = vcmp.lt.s32.totalorder (!%p3321_p12), %v3022_v16, %v3045_v41 }
0x1281   : > { %v3324_v48 = vsel (!%p3321_p12), %vm3046_vm8, 1.0, %v3886_v42 }
0x12fb   : > { %v2758_v50 = vpop.xlane.xlu1 %2757 }
0x12fc   : > { %v2760_v44 = vmul.f32 0.03125, %v2758_v50  ;;  %v3060_v50 = vstv (!%p3321_p12), %s3059_s24 }
0x12fe   : > { %v2762_v52 = vadd.f32 1e-05, %v2760_v44 }
0x1300   : > { %3683 = vrsqrt.f32 %v2762_v52 }
0x130a   : > { %v3684_v54 = vpop.eup %3683 }
0x130b   : > { %v2766_v55 = vmul.f32 %v3684_v54, %v2750_v13 }
0x130d   : > { %v2774_v56 = vmul.f32 %v3311_v37, %v2766_v55 }
0x130f   : > { %v2782_v57 = vadd.f32 %v3312_v38, %v2774_v56 }
0x1311   : > { %3539 = vmatmul.mubr.msk.f32.vlgmr.msra.gmra.mrb[24].mxu0 %vm685_vm1, %v2782_v57 }
0x13e4   : > { %v3540_v61 = vpop.f32.mrb[24].mxu0 }
0x13e5   : > { %v2872_v47 = vadd.f32 %v3540_v61, %v3313_v21  ;;  %v2866_v62 = vpop.f32.mrb[25].mxu0 }
0x13e6   : > { %v2867_v63 = vadd.f32 %v3313_v21, %v2866_v62 }
0x13e7   : > { %v2876_v1 = vmax.f32 %v2872_v47, 0.0 }
0x13e8   : > { %v2875_v0 = vmax.f32 %v2867_v63, 0.0 }
0x13ea   : > { %3549 = vmatprep.mubr.msk.f32.mxu1 %vm685_vm1, %v2875_v0 }
0x13eb   : > { %3550 = vmatmul.mubr.msk.f32.vlgmr.msra.gmra.mrb[26].mxu1 %vm685_vm1, %v2876_v1 }
0x14be   : > { %v3551_v10 = vpop.f32.mrb[26].mxu1 }
0x14bf   : > { %v2960_v51 = vpop.f32.mrb[27].mxu1  ;;  %v2966_v3 = vadd.f32 %v3551_v10, %v3316_v2 }
0x14c0   : > { %v2961_v4 = vadd.f32 %v3316_v2, %v2960_v51 }
0x14c1   : > { %v2970_v8 = vadd.f32 %v2966_v3, %v2782_v57 }
0x14c2   : > { %v2969_v5 = vadd.f32 %v2961_v4, %v2781_v39  ;;  %v3024_v39 = vstv (!%p3321_p12), %s3023_s6 }
0x14c3   : > { %v2976_v11 = vsel %vm685_vm1, %v2970_v8, 0.0  ;;  %vm3025_vm7 = vcmp.lt.s32.totalorder (!%p3321_p12), %v3022_v16, %v3024_v39 }
0x14c4   : > { %v2973_v7 = vsel %vm685_vm1, %v2969_v5, 0.0  ;;  %v3322_v43 = vsel (!%p3321_p12), %vm3025_vm7, 1.0, %v3886_v42 }
0x14c5   : > { %2974 = vadd.xlane.f32.xlu1 %v2973_v7 }
0x14c9   : > { %2977 = vadd.xlane.f32.xlu1 %v2976_v11 }
0x1552   : > { %v2975_v12 = vpop.xlane.xlu1 %2974 }
0x1553   : > { %v2979_v14 = vmul.f32 0.03125, %v2975_v12 }
0x1555   : > { %v2981_v15 = vsub.f32 %v2969_v5, %v2979_v14 }
0x1556   : > { %v2978_v17 = vpop.xlane.xlu1 %2977 }
0x1557   : > { %v2980_v18 = vmul.f32 0.03125, %v2978_v17  ;;  %v2983_v6 = vmul.f32 %v2981_v15, %v2981_v15 }
0x1559   : > { %v2982_v19 = vsub.f32 %v2970_v8, %v2980_v18  ;;  %v2985_v22 = vsel %vm685_vm1, %v2983_v6, 0.0 }
0x155a   : > { %2986 = vadd.xlane.f32.xlu0 %v2985_v22 }
0x155b   : > { %v2984_v23 = vmul.f32 %v2982_v19, %v2982_v19 }
0x155d   : > { %v2988_v26 = vsel %vm685_vm1, %v2984_v23, 0.0 }
0x155e   : > { %2989 = vadd.xlane.f32.xlu1 %v2988_v26 }
0x15e7   : > { %v2987_v27 = vpop.xlane.xlu0 %2986 }
0x15e8   : > { %v2991_v28 = vmul.f32 0.03125, %v2987_v27 }
0x15ea   : > { %v2993_v29 = vadd.f32 1e-05, %v2991_v28 }
0x15eb   : > { %v2990_v30 = vpop.xlane.xlu1 %2989 }
0x15ec   : > { %3685 = vrsqrt.f32 %v2993_v29  ;;  %v2992_v31 = vmul.f32 0.03125, %v2990_v30 }
0x15ee   : > { %v2994_v32 = vadd.f32 1e-05, %v2992_v31 }
0x15f0   : > { %3687 = vrsqrt.f32 %v2994_v32 }
0x15f1   : > { %3689 = vrcp.f32 (!%p3321_p12), %v3039_v46 }
0x15f2   : > { %3691 = vrcp.f32 (!%p3321_p12), %v3060_v50 }
0x15f6   : > { %v3686_v13 = vpop.eup %3685 }
0x15f7   : > { %v2997_v53 = vmul.f32 %v3686_v13, %v2981_v15 }
0x15f9   : > { %v3005_v35 = vmul.f32 %v3319_v33, %v2997_v53 }
0x15fa   : > { %v3688_v9 = vpop.eup %3687 }
0x15fb   : > { %v3013_v36 = vadd.f32 %v3320_v34, %v3005_v35  ;;  %v2998_v37 = vmul.f32 %v3688_v9, %v2982_v19  ;;  %3020 = sbr.rel (%p3321_p12) target bundleno = 5659 (0x161b), region = 92  ;;  %v3690_v61 = vpop.eup (!%p3321_p12), %3689 }
0x15fc   : > { %v3692_v62 = vpop.eup (!%p3321_p12), %3691 }
0x15fd   : > { %3015 = vst.msk [vmem:[#allocation2] sm:$0xff] %vm685_vm1, %v3013_v36  ;;  %v3006_v24 = vmul.f32 %v3319_v33, %v2998_v37 }
0x15ff   : > { %v3014_v38 = vadd.f32 %v3320_v34, %v3006_v24 }
0x1601   : > { %3016 = vst.msk [vmem:[#allocation2 + $0x8] sm:$0xff] %vm685_vm1, %v3014_v38 }
0x1604   : > { %v3028_v40 = vld [vmem:[#allocation2] sm:$0xff] }
0x1605   : > { %v3029_v45 = vmul.f32 %v3322_v43, %v3028_v40 }
0x1607   : > { %v3030_v44 = vsel %vm685_vm1, %v3029_v45, 0.0 }
0x1608   : > { %v3049_v25 = vld [vmem:[#allocation2 + $0x8] sm:$0xff]  ;;  %v3031_v20 = vrot.slane %v3030_v44, 4 }
0x1609   : > { %v3050_v49 = vmul.f32 %v3324_v48, %v3049_v25 }
0x160a   : > { %v3032_v55 = vadd.f32 %v3031_v20, %v3030_v44 }
0x160b   : > { %v3051_v52 = vsel %vm685_vm1, %v3050_v49, 0.0 }
0x160c   : > { %v3052_v54 = vrot.slane %v3051_v52, 4  ;;  %v3033_v57 = vrot.slane %v3032_v55, 2 }
0x160e   : > { %v3053_v56 = vadd.f32 %v3052_v54, %v3051_v52  ;;  %v3034_v59 = vadd.f32 %v3033_v57, %v3032_v55 }
0x1610   : > { %v3054_v58 = vrot.slane %v3053_v56, 2  ;;  %v3035_v21 = vrot.slane %v3034_v59, 1 }
0x1612   : > { %v3055_v60 = vadd.f32 %v3054_v58, %v3053_v56  ;;  %v3036_v63 = vadd.f32 %v3035_v21, %v3034_v59 }
0x1614   : > { %v3056_v47 = vrot.slane %v3055_v60, 1  ;;  %v3041_v1 = vmul.f32 %v3690_v61, %v3036_v63 }
0x1616   : > { %v3057_v0 = vadd.f32 %v3056_v47, %v3055_v60  ;;  %3043 = vst.msk [vmem:[#allocation13] sm:$0x1] %vm3042_vm9, %v3041_v1 }
0x1618   : > { %v3062_v2 = vmul.f32 %v3692_v62, %v3057_v0 }
0x161a   : > { %3063 = vst.msk [vmem:[#allocation13 + $0x1] sm:$0x1] %vm3042_vm9, %v3062_v2 }
0x161b PF: > { %p3597_p0 = scmp.eq.s32.totalorder %s3985_s21, 1  ;;  %s3887_s18 = smov [#allocation13]  }
0x161c   : > { %s3071_s28 = sshll.u32 %s3887_s18, 4  ;;  %s3072_s28 = int_to_ptr.vmem [resolvable:$true] %s3071_s28 }
0x161d   : > { %s3795_s13 = scalar_lea.vmem %s3072_s28, 32  ;;  %p3802_p11 = scmp.lt.s32.totalorder %s3072_s28, %s3072_s28 }
0x161e   : > { %p3796_p5 = scmp.ne.s32.totalorder %s3072_s28, %s3795_s13  ;;  %p3803_p1 = scmp.lt.s32.totalorder %s3795_s13, %s3795_s13 }
0x1620   : > { %p3797_p8 = pnand %p3796_p5, %p3597_p0  ;;  %p3804_p9 = por %p3803_p1, %p3802_p11 }
0x1622   : > { %p3798_p10 = pneg %p3797_p8 }
0x1624   : > { %p3805_p4 = pnand %p3804_p9, %p3798_p10 }
0x1626   : > { %3808 = shalt.err (!%p3805_p4)
}
0x1627   : > { %s4604_s11 = sld [smem:[#allocation29_spill]] }
0x162d   : > { %s3809_s27 = scalar_lea.hbm %s4604_s11, 32 }
0x162e   : > { %p3810_p6 = scmp.ne.s32.totalorder %s4604_s11, %s3809_s27  ;;  %p3815_p13 = scmp.lt.u32.totalorder %s3809_s27, %s4604_s11 }
0x1630   : > { %p3811_p3 = pnand %p3810_p6, %p3597_p0 }
0x1632   : > { %p3812_p2 = pneg %p3811_p3 }
0x1634   : > { %p3817_p7 = pnand %p3815_p13, %p3812_p2 }
0x1636   : > { %3820 = shalt.err (!%p3817_p7)
}
0x1637   : > { %3583 = dma.vmem_to_hbm [thread:$0]  (%p3597_p0), %s3072_s28, 32, %s4604_s11, [#allocation9]  }
0x1638   : > { %3848 = dma.done.wait (%p3597_p0), [#allocation9], 32  }
0x1639   : > { %3850 = vsyncadd (%p3597_p0), [#allocation9], 4294967264 }
0x163a PF: > { %s4605_s20 = sld [smem:[#allocation19_spill]]  ;;  %s4606_s4 = sld [smem:[#allocation18_spill]] }
0x163b   : > { %s4607_s19 = sld [smem:[#allocation20_spill]]  ;;  %s4608_s18 = smov %s3857_s0 }
0x1640   : > { %p34_p12 = scmp.ge.s32.totalorder %s4605_s20, 4   ;;  %s4609_s0 = smov %s4606_s4 }
0x1642   :  { %36 = sbr.rel (!%p34_p12) target bundleno = 23 (0x17), region = 171 }
0x1649   :  { %3084 = vsyncpa [#allocation8], 1 }
0x164a   :  { %3086 = vsyncpa [#allocation8 + $0x1], 1 }
0x164b   :  { %3087 = vsyncpa [#allocation11], 1 }
0x164c   :  { %3089 = vsyncpa [#allocation11 + $0x1], 1 }
0x164d   :  { %3090 = vsyncpa [#allocation9], 1 }
0x164e   :  { %3092 = vsyncpa [#allocation9 + $0x1], 1 }

</bundles_post_ra>
